<compile_context>
chip_gen: v7x
topology: tpu7x:2x2x1
jax: 0.10.0
libtpu: 0.0.40
codegen_flags: <defaults>
</compile_context>

<pallas_src>
import functools

import jax
import jax.numpy as jnp
from jax.experimental import pallas as pl
from jax.experimental.pallas import tpu as pltpu


def _residual_block_kernel(xcat_ref, x_ref, temb_ref,
                           wfused_ref, bfused_ref, wout_ref, bout_ref,
                           out_ref, skip_ref):
    """One (hw-tile, batch) grid step. All tensors are (C, HW-tile):
    lane axis = HW tile (multiple of 128) -> lane-dense loads/stores."""
    f32 = jnp.float32

    # Fused dilated 3x3 conv (im2col, K=9*Cin) + condition 1x1 conv (K=Cd):
    # h = W_fused (256, K) @ xcat (K, tile) -- bf16 MXU, f32 accumulation.
    h = jnp.dot(wfused_ref[...], xcat_ref[0], preferred_element_type=f32)
    # Pre-summed conv biases + per-batch timestep embedding (f32 VPU adds).
    h = h + bfused_ref[...] + temb_ref[0]

    # Gated activation in f32 (v5e has no bf16 VPU/EUP datapath).
    g = jnp.tanh(h) * jax.nn.sigmoid(h)

    # Output 1x1 conv: res = W_out (Cin, 256) @ g (256, tile).
    res = jnp.dot(wout_ref[...], g.astype(wout_ref.dtype),
                  preferred_element_type=f32)
    res = res + bout_ref[...]

    skip_ref[0] = res.astype(skip_ref.dtype)
    out_ref[0] = (x_ref[0] + res).astype(out_ref.dtype)


def _pick_hw_tile(hw, max_tile=1024):
    """Largest multiple-of-128 divisor of hw, capped at max_tile.
    Falls back to the full extent when hw is not a multiple of 128
    (the full-dim exception to the (8,128) BlockSpec rule)."""
    if hw % 128 != 0:
        return hw
    best = 128
    t = 128
    while t <= min(hw, max_tile):
        if hw % t == 0:
            best = t
        t += 128
    return best


def residual_block(x, t_emb, condition,
                   w_dil, b_dil, w_cond, b_cond, w_out, b_out, *, dilation):
    """Fused _ResidualBlock forward.

    Args:
      x:         (B, Cin, H, W) float32
      t_emb:     (B, 256, 1, 1) float32
      condition: (B, Cd, H, W) float32
      w_dil:     (256, Cin, 3, 3)   (PyTorch OIHW)
      b_dil:     (256,)
      w_cond:    (256, Cd, 1, 1)
      b_cond:    (256,)
      w_out:     (Cin, 256, 1, 1)
      b_out:     (Cin,)
    Returns:
      (x + residual, residual), both (B, Cin, H, W)
    """
    # TODO(synk): condition=None branch of the PyTorch forward would use a
    # kernel variant without the condition part of the fused matmul.
    assert condition is not None

    B, Cin, H, W = x.shape
    Cmid = w_dil.shape[0]                 # 256
    Cd = w_cond.shape[1]
    d = int(dilation)
    HW = H * W
    K = 9 * Cin + Cd

    # ---- layout plumbing (plain JAX, channels-first -> no transposes) ----
    # im2col along the channel axis: (B, 9*Cin, H, W) -> (B, 9*Cin, HW).
    # TODO(synk): at large H*W, build the 9 taps in VMEM from a single padded
    # x tile instead of materializing the 9x im2col in HBM.
    x_pad = jnp.pad(x, ((0, 0), (0, 0), (d, d), (d, d)))
    taps = [x_pad[:, :, kh * d:kh * d + H, kw * d:kw * d + W]
            for kh in range(3) for kw in range(3)]
    x_taps = jnp.concatenate(taps, axis=1).reshape(B, 9 * Cin, HW)
    cond_flat = condition.reshape(B, Cd, HW)
    xcat = jnp.concatenate([x_taps, cond_flat], axis=1).astype(jnp.bfloat16)
    x_flat = x.reshape(B, Cin, HW)                           # f32, residual add
    temb = t_emb.reshape(B, Cmid, 1)                         # f32

    # ---- weight repack: OIHW -> (O, K) matching the tap/channel K ordering ----
    w_dil_m = jnp.transpose(w_dil, (0, 2, 3, 1)).reshape(Cmid, 9 * Cin)
    w_cond_m = w_cond.reshape(Cmid, Cd)
    w_fused = jnp.concatenate([w_dil_m, w_cond_m], axis=1).astype(jnp.bfloat16)
    b_fused = (b_dil + b_cond).reshape(Cmid, 1)              # f32
    w_out_m = w_out.reshape(Cin, Cmid).astype(jnp.bfloat16)
    b_out_m = b_out.reshape(Cin, 1)                          # f32

    tile = _pick_hw_tile(HW)
    num_tiles = HW // tile
    # HW-tile axis first so v7x megacore has parallel work even when B == 1.
    grid = (num_tiles, B)

    out_flat, skip_flat = pl.pallas_call(
        _residual_block_kernel,
        out_shape=(jax.ShapeDtypeStruct((B, Cin, HW), x.dtype),
                   jax.ShapeDtypeStruct((B, Cin, HW), x.dtype)),
        grid=grid,
        in_specs=[
            pl.BlockSpec((1, K, tile), lambda t, b: (b, 0, t)),      # xcat (bf16)
            pl.BlockSpec((1, Cin, tile), lambda t, b: (b, 0, t)),    # x residual
            pl.BlockSpec((1, Cmid, 1), lambda t, b: (b, 0, 0)),      # timestep emb
            pl.BlockSpec((Cmid, K), lambda t, b: (0, 0)),            # fused weight
            pl.BlockSpec((Cmid, 1), lambda t, b: (0, 0)),            # fused bias
            pl.BlockSpec((Cin, Cmid), lambda t, b: (0, 0)),          # output weight
            pl.BlockSpec((Cin, 1), lambda t, b: (0, 0)),             # output bias
        ],
        out_specs=(pl.BlockSpec((1, Cin, tile), lambda t, b: (b, 0, t)),
                   pl.BlockSpec((1, Cin, tile), lambda t, b: (b, 0, t))),
        compiler_params=pltpu.CompilerParams(
            dimension_semantics=("parallel", "parallel"),
            vmem_limit_bytes=48 * 1024 * 1024),
    )(xcat, x_flat, temb, w_fused, b_fused, w_out_m, b_out_m)

    out = out_flat.reshape(B, Cin, H, W)
    skip = skip_flat.reshape(B, Cin, H, W)
    return out, skip


if __name__ == "__main__":
    B, Cin, H, W = 2, 4, 16, 16
    Cd = 8
    Cmid = 256
    dil = 2

    key = jax.random.PRNGKey(0)
    ks = jax.random.split(key, 9)

    x = jax.random.normal(ks[0], (B, Cin, H, W), jnp.float32)
    condition = jax.random.normal(ks[1], (B, Cd, H, W), jnp.float32)
    t_emb = jax.random.uniform(ks[2], (B, Cmid, 1, 1), jnp.float32)

    # PyTorch-Conv-like uniform init.
    lim_d = 1.0 / float(jnp.sqrt(jnp.float32(Cin * 9)))
    lim_c = 1.0 / float(jnp.sqrt(jnp.float32(Cd)))
    lim_o = 1.0 / float(jnp.sqrt(jnp.float32(Cmid)))
    w_dil = jax.random.uniform(ks[3], (Cmid, Cin, 3, 3), jnp.float32, -lim_d, lim_d)
    b_dil = jax.random.uniform(ks[4], (Cmid,), jnp.float32, -lim_d, lim_d)
    w_cond = jax.random.uniform(ks[5], (Cmid, Cd, 1, 1), jnp.float32, -lim_c, lim_c)
    b_cond = jax.random.uniform(ks[6], (Cmid,), jnp.float32, -lim_c, lim_c)
    w_out = jax.random.uniform(ks[7], (Cin, Cmid, 1, 1), jnp.float32, -lim_o, lim_o)
    b_out = jax.random.uniform(ks[8], (Cin,), jnp.float32, -lim_o, lim_o)

    run = jax.jit(functools.partial(residual_block, dilation=dil))
    out, skip = run(x, t_emb, condition,
                    w_dil, b_dil, w_cond, b_cond, w_out, b_out)
    out, skip = jax.block_until_ready((out, skip))

    # ---- pure-JAX reference (exact f32; kernel uses bf16 MXU operands, so
    # tolerances are loosened accordingly) ----
    hp = jax.lax.Precision.HIGHEST
    h_ref = jax.lax.conv_general_dilated(
        x, w_dil, window_strides=(1, 1),
        padding=((dil, dil), (dil, dil)), rhs_dilation=(dil, dil),
        dimension_numbers=("NCHW", "OIHW", "NCHW"),
        precision=hp) + b_dil.reshape(1, Cmid, 1, 1)
    h_ref = h_ref + t_emb
    h_ref = h_ref + jnp.einsum("bchw,oc->bohw", condition, w_cond.reshape(Cmid, Cd),
                               precision=hp) + b_cond.reshape(1, Cmid, 1, 1)
    g_ref = jnp.tanh(h_ref) * jax.nn.sigmoid(h_ref)
    skip_ref = jnp.einsum("bchw,oc->bohw", g_ref, w_out.reshape(Cin, Cmid),
                          precision=hp) + b_out.reshape(1, Cin, 1, 1)
    out_ref = x + skip_ref

    assert out.shape == (B, Cin, H, W) and skip.shape == (B, Cin, H, W)
    assert jnp.allclose(skip, skip_ref, atol=5e-2, rtol=5e-2), \
        float(jnp.max(jnp.abs(skip - skip_ref)))
    assert jnp.allclose(out, out_ref, atol=5e-2, rtol=5e-2), \
        float(jnp.max(jnp.abs(out - out_ref)))

    print("KERNEL_OK")
</pallas_src>

<mosaic_0001>
module attributes {stable_mosaic.version = 11 : i64} {
  func.func @_residual_block_kernel(%arg0: i32, %arg1: i32, %arg2: memref<1x44x256xbf16, #tpu.memory_space<vmem>>, %arg3: memref<1x4x256xf32, #tpu.memory_space<vmem>>, %arg4: memref<1x256x1xf32, #tpu.memory_space<vmem>>, %arg5: memref<256x44xbf16, #tpu.memory_space<vmem>>, %arg6: memref<256x1xf32, #tpu.memory_space<vmem>>, %arg7: memref<4x256xbf16, #tpu.memory_space<vmem>>, %arg8: memref<4x1xf32, #tpu.memory_space<vmem>>, %arg9: memref<1x4x256xf32, #tpu.memory_space<vmem>>, %arg10: memref<1x4x256xf32, #tpu.memory_space<vmem>>) attributes {dimension_semantics = [#tpu.dimension_semantics<parallel>, #tpu.dimension_semantics<parallel>], iteration_bounds = array<i64: 1, 2>, scalar_prefetch = 0 : i64, scratch_operands = 0 : i64, tpu.core_type = #tpu.core_type<tc>, window_params = [{transform_indices = @transform_0, window_bounds = array<i64: 1, 44, 256>}, {transform_indices = @transform_1, window_bounds = array<i64: 1, 4, 256>}, {transform_indices = @transform_2, window_bounds = array<i64: 1, 256, 1>}, {pipeline_mode = #tpu.pipeline_mode<synchronous>, transform_indices = @transform_3, window_bounds = array<i64: 256, 44>}, {pipeline_mode = #tpu.pipeline_mode<synchronous>, transform_indices = @transform_4, window_bounds = array<i64: 256, 1>}, {pipeline_mode = #tpu.pipeline_mode<synchronous>, transform_indices = @transform_5, window_bounds = array<i64: 4, 256>}, {pipeline_mode = #tpu.pipeline_mode<synchronous>, transform_indices = @transform_6, window_bounds = array<i64: 4, 1>}, {transform_indices = @transform_7, window_bounds = array<i64: 1, 4, 256>}, {transform_indices = @transform_8, window_bounds = array<i64: 1, 4, 256>}]} {
    %c0 = arith.constant 0 : index
    %c0_0 = arith.constant 0 : index
    %0 = vector.load %arg5[%c0, %c0_0] : memref<256x44xbf16, #tpu.memory_space<vmem>>, vector<256x44xbf16>
    %c0_1 = arith.constant 0 : index
    %c0_2 = arith.constant 0 : index
    %c0_3 = arith.constant 0 : index
    %1 = vector.load %arg2[%c0_1, %c0_2, %c0_3] : memref<1x44x256xbf16, #tpu.memory_space<vmem>>, vector<1x44x256xbf16>
    %2 = vector.shape_cast %1 : vector<1x44x256xbf16> to vector<44x256xbf16>
    %cst = arith.constant dense<0.000000e+00> : vector<256x256xf32>
    %3 = tpu.matmul %0, %2, %cst {dimension_numbers = #tpu.dot_dimension_numbers<[1], [0], [0], [1], [0, 0, 1, 1], [], []>} : vector<256x44xbf16>, vector<44x256xbf16>, vector<256x256xf32> -> vector<256x256xf32>
    %c0_4 = arith.constant 0 : index
    %c0_5 = arith.constant 0 : index
    %4 = vector.load %arg6[%c0_4, %c0_5] : memref<256x1xf32, #tpu.memory_space<vmem>>, vector<256x1xf32>
    %5 = vector.broadcast %4 : vector<256x1xf32> to vector<256x256xf32>
    %6 = arith.addf %3, %5 : vector<256x256xf32>
    %c0_6 = arith.constant 0 : index
    %c0_7 = arith.constant 0 : index
    %c0_8 = arith.constant 0 : index
    %7 = vector.load %arg4[%c0_6, %c0_7, %c0_8] : memref<1x256x1xf32, #tpu.memory_space<vmem>>, vector<1x256x1xf32>
    %8 = vector.shape_cast %7 : vector<1x256x1xf32> to vector<256x1xf32>
    %9 = vector.broadcast %8 : vector<256x1xf32> to vector<256x256xf32>
    %10 = arith.addf %6, %9 : vector<256x256xf32>
    %11 = math.tanh %10 : vector<256x256xf32>
    %12 = arith.negf %10 : vector<256x256xf32>
    %13 = math.exp %12 : vector<256x256xf32>
    %cst_9 = arith.constant 1.000000e+00 : f32
    %14 = vector.broadcast %cst_9 : f32 to vector<256x256xf32>
    %15 = arith.addf %14, %13 : vector<256x256xf32>
    %16 = arith.divf %14, %15 : vector<256x256xf32>
    %17 = arith.mulf %11, %16 : vector<256x256xf32>
    %c0_10 = arith.constant 0 : index
    %c0_11 = arith.constant 0 : index
    %18 = vector.load %arg7[%c0_10, %c0_11] : memref<4x256xbf16, #tpu.memory_space<vmem>>, vector<4x256xbf16>
    %19 = arith.truncf %17 : vector<256x256xf32> to vector<256x256xbf16>
    %cst_12 = arith.constant dense<0.000000e+00> : vector<4x256xf32>
    %20 = tpu.matmul %18, %19, %cst_12 {dimension_numbers = #tpu.dot_dimension_numbers<[1], [0], [0], [1], [0, 0, 1, 1], [], []>} : vector<4x256xbf16>, vector<256x256xbf16>, vector<4x256xf32> -> vector<4x256xf32>
    %c0_13 = arith.constant 0 : index
    %c0_14 = arith.constant 0 : index
    %21 = vector.load %arg8[%c0_13, %c0_14] : memref<4x1xf32, #tpu.memory_space<vmem>>, vector<4x1xf32>
    %22 = vector.broadcast %21 : vector<4x1xf32> to vector<4x256xf32>
    %23 = arith.addf %20, %22 : vector<4x256xf32>
    %c0_15 = arith.constant 0 : index
    %c0_16 = arith.constant 0 : index
    %c0_17 = arith.constant 0 : index
    %24 = vector.load %arg10[%c0_15, %c0_16, %c0_17] : memref<1x4x256xf32, #tpu.memory_space<vmem>>, vector<1x4x256xf32>
    %25 = vector.shape_cast %24 : vector<1x4x256xf32> to vector<4x256xf32>
    %26 = vector.shape_cast %23 : vector<4x256xf32> to vector<1x4x256xf32>
    tpu.vector_store %arg10[%c0_15, %c0_16, %c0_17], %26 {strides = array<i32>} : memref<1x4x256xf32, #tpu.memory_space<vmem>>, vector<1x4x256xf32>,
    %c0_18 = arith.constant 0 : index
    %c0_19 = arith.constant 0 : index
    %c0_20 = arith.constant 0 : index
    %27 = vector.load %arg3[%c0_18, %c0_19, %c0_20] : memref<1x4x256xf32, #tpu.memory_space<vmem>>, vector<1x4x256xf32>
    %28 = vector.shape_cast %27 : vector<1x4x256xf32> to vector<4x256xf32>
    %29 = arith.addf %28, %23 : vector<4x256xf32>
    %c0_21 = arith.constant 0 : index
    %c0_22 = arith.constant 0 : index
    %c0_23 = arith.constant 0 : index
    %30 = vector.load %arg9[%c0_21, %c0_22, %c0_23] : memref<1x4x256xf32, #tpu.memory_space<vmem>>, vector<1x4x256xf32>
    %31 = vector.shape_cast %30 : vector<1x4x256xf32> to vector<4x256xf32>
    %32 = vector.shape_cast %29 : vector<4x256xf32> to vector<1x4x256xf32>
    tpu.vector_store %arg9[%c0_21, %c0_22, %c0_23], %32 {strides = array<i32>} : memref<1x4x256xf32, #tpu.memory_space<vmem>>, vector<1x4x256xf32>,
    return
  }
  func.func @transform_0(%arg0: i32, %arg1: i32) -> (i32, i32, i32) {
    %c0_i32 = arith.constant 0 : i32
    %c0_i32_0 = arith.constant 0 : i32
    return %arg1, %c0_i32, %arg0 : i32, i32, i32
  }
  func.func @transform_1(%arg0: i32, %arg1: i32) -> (i32, i32, i32) {
    %c0_i32 = arith.constant 0 : i32
    %c0_i32_0 = arith.constant 0 : i32
    return %arg1, %c0_i32, %arg0 : i32, i32, i32
  }
  func.func @transform_2(%arg0: i32, %arg1: i32) -> (i32, i32, i32) {
    %c0_i32 = arith.constant 0 : i32
    %c0_i32_0 = arith.constant 0 : i32
    %c0_i32_1 = arith.constant 0 : i32
    return %arg1, %c0_i32, %c0_i32_0 : i32, i32, i32
  }
  func.func @transform_3(%arg0: i32, %arg1: i32) -> (i32, i32) {
    %c0_i32 = arith.constant 0 : i32
    %c0_i32_0 = arith.constant 0 : i32
    %c0_i32_1 = arith.constant 0 : i32
    return %c0_i32, %c0_i32_0 : i32, i32
  }
  func.func @transform_4(%arg0: i32, %arg1: i32) -> (i32, i32) {
    %c0_i32 = arith.constant 0 : i32
    %c0_i32_0 = arith.constant 0 : i32
    %c0_i32_1 = arith.constant 0 : i32
    return %c0_i32, %c0_i32_0 : i32, i32
  }
  func.func @transform_5(%arg0: i32, %arg1: i32) -> (i32, i32) {
    %c0_i32 = arith.constant 0 : i32
    %c0_i32_0 = arith.constant 0 : i32
    %c0_i32_1 = arith.constant 0 : i32
    return %c0_i32, %c0_i32_0 : i32, i32
  }
  func.func @transform_6(%arg0: i32, %arg1: i32) -> (i32, i32) {
    %c0_i32 = arith.constant 0 : i32
    %c0_i32_0 = arith.constant 0 : i32
    %c0_i32_1 = arith.constant 0 : i32
    return %c0_i32, %c0_i32_0 : i32, i32
  }
  func.func @transform_7(%arg0: i32, %arg1: i32) -> (i32, i32, i32) {
    %c0_i32 = arith.constant 0 : i32
    %c0_i32_0 = arith.constant 0 : i32
    return %arg1, %c0_i32, %arg0 : i32, i32, i32
  }
  func.func @transform_8(%arg0: i32, %arg1: i32) -> (i32, i32, i32) {
    %c0_i32 = arith.constant 0 : i32
    %c0_i32_0 = arith.constant 0 : i32
    return %arg1, %c0_i32, %arg0 : i32, i32, i32
  }
}

</mosaic_0001>

<bundles_post_ra>
// kernel: residual_block.1
= control target key start
LH: loop header
LB: loop body
LE: loop exit
PB: predicated region body
PF: predicated region fallthrough
CT: control target
= control target key end

     0   :  { %s2678_s27 = smov 0   ;;  %s2680_s28 = smov 0   ;;  %s3296_s0 = inlined_call_operand.vmem [shape: bf16[2,44,256], index: 0, kind: input, shape index: {}]   ;;  %s3297_s1 = inlined_call_operand.vmem [shape: f32[2,4,256], index: 1, kind: input, shape index: {}]   ;;  %s3298_s2 = inlined_call_operand.vmem [shape: f32[2,256,1], index: 2, kind: input, shape index: {}]   ;;  %s3299_s3 = inlined_call_operand.vmem [shape: bf16[256,44], index: 3, kind: input, shape index: {}]   ;;  %s3300_s4 = inlined_call_operand.vmem [shape: f32[256,1], index: 4, kind: input, shape index: {}]   ;;  %s3301_s5 = inlined_call_operand.vmem [shape: bf16[4,256], index: 5, kind: input, shape index: {}]   ;;  %s3302_s6 = inlined_call_operand.vmem [shape: f32[4,1], index: 6, kind: input, shape index: {}]   ;;  %s3303_s7 = inlined_call_operand.vmem [shape: f32[2,4,256], index: 7, kind: output, shape index: {0}]   ;;  %s3304_s8 = inlined_call_operand.vmem [shape: f32[2,4,256], index: 8, kind: output, shape index: {1}]  }
   0x1   :  { %s2682_s29 = smov 0  }
   0x2 LB: > { %s28_s30 = sadd.s32 1, %s2626_s28  ;;  %p2051_p0 = scmp.ge.s32.totalorder %s2630_s29, 1  ;;  %s2630_s29 = sphi %s2682_s29, %s19_s29   ;;  %s2626_s28 = sphi %s2680_s28, %s3306_s28   ;;  %s2622_s27 = sphi %s2678_s27, %s3305_s27  }
   0x3   : > { %p29_p1 = scmp.ge.s32.totalorder %s28_s30, 2  ;;  %p315_p2 = scmp.lt.s32.totalorder %s2630_s29, 3 }
   0x5   : > { %s3308_s30 = smov (%p29_p1, %s28_s30), 0  ;;  %p316_p3 = pnand %p2051_p0, %p315_p2 }
   0x6   : > { %v464_v0 = vld [vmem:[%s3300_s4] sm:$0xff] (!%p316_p3)  ;;  %p381_p4 = scmp.lt.s32.totalorder (!%p316_p3), %s2622_s27, 1  ;;  %v2632_v1 = vmov (!%p316_p3), 0   ;;  %v465_v2 = vld [vmem:[%s3300_s4 + $0x8] sm:$0xff] (!%p316_p3)  ;;  %v466_v4 = vld [vmem:[%s3300_s4 + $0x10] sm:$0xff] (!%p316_p3)  ;;  %vm813_vm0 = vcmask (!%p316_p3), 1045504  }
   0x7   : > { %319 = sbr.rel (%p316_p3) target bundleno = 686 (0x2ae), region = 48  ;;  %2197 = vset.pattern.permute.xlu0 (!%p316_p3), %v2632_v1  ;;  %2198 = vset.pattern.permute.xlu1 (!%p316_p3), %v2632_v1  ;;  %v467_v13 = vld [vmem:[%s3300_s4 + $0x18] sm:$0xff] (!%p316_p3)  ;;  %v468_v14 = vld [vmem:[%s3300_s4 + $0x20] sm:$0xff] (!%p316_p3)  ;;  %vm764_vm1 = vcmask (!%p316_p3), 359424   ;;  %v469_v19 = vld [vmem:[%s3300_s4 + $0x28] sm:$0xff] (!%p316_p3) }
   0x8   : > { %498 = vperm.xlu0 (!%p316_p3), %2197, %v464_v0   ;;  %852 = vmatprep.mubr.bf16.mxu0 (!%p316_p3), %v2632_v1  ;;  %v2208_v17 = vld [vmem:[%s3299_s3] sm:$0xff] (!%p316_p3)   ;;  %v470_v20 = vld [vmem:[%s3300_s4 + $0x30] sm:$0xff] (!%p316_p3)  ;;  %v2209_v22 = vld [vmem:[%s3299_s3 + $0x8] sm:$0xff] (!%p316_p3)  }
   0x9   : > { %v471_v24 = vld [vmem:[%s3300_s4 + $0x38] sm:$0xff] (!%p316_p3)  ;;  %v472_v25 = vld [vmem:[%s3300_s4 + $0x40] sm:$0xff] (!%p316_p3)  ;;  %v2210_v27 = vld [vmem:[%s3299_s3 + $0x10] sm:$0xff] (!%p316_p3)  }
   0xa   : > { %v473_v29 = vld [vmem:[%s3300_s4 + $0x48] sm:$0xff] (!%p316_p3)  ;;  %v474_v30 = vld [vmem:[%s3300_s4 + $0x50] sm:$0xff] (!%p316_p3)  ;;  %v2211_v32 = vld [vmem:[%s3299_s3 + $0x18] sm:$0xff] (!%p316_p3)  }
   0xb   : > { %v475_v34 = vld [vmem:[%s3300_s4 + $0x58] sm:$0xff] (!%p316_p3)  ;;  %v476_v35 = vld [vmem:[%s3300_s4 + $0x60] sm:$0xff] (!%p316_p3)  ;;  %v477_v39 = vld [vmem:[%s3300_s4 + $0x68] sm:$0xff] (!%p316_p3) }
   0xc   : > { %503 = vperm.xlu0 (!%p316_p3), %2197, %v465_v2   ;;  %v2212_v37 = vld [vmem:[%s3299_s3 + $0x20] sm:$0xff] (!%p316_p3)   ;;  %v478_v40 = vld [vmem:[%s3300_s4 + $0x70] sm:$0xff] (!%p316_p3)  ;;  %v2213_v42 = vld [vmem:[%s3299_s3 + $0x28] sm:$0xff] (!%p316_p3)  }
   0xd   : > { %v479_v44 = vld [vmem:[%s3300_s4 + $0x78] sm:$0xff] (!%p316_p3)  ;;  %v480_v45 = vld [vmem:[%s3300_s4 + $0x80] sm:$0xff] (!%p316_p3)  ;;  %v2214_v47 = vld [vmem:[%s3299_s3 + $0x30] sm:$0xff] (!%p316_p3)  }
   0xe   : > { %s3310_s27 = smov (!%p381_p4, %s2622_s27), 1  ;;  %v481_v49 = vld [vmem:[%s3300_s4 + $0x88] sm:$0xff]  ;;  %v482_v50 = vld [vmem:[%s3300_s4 + $0x90] sm:$0xff]  ;;  %v2215_v52 = vld [vmem:[%s3299_s3 + $0x38] sm:$0xff]  }
   0xf   : > { %s2168_s13 = sshll.u32 %s3310_s27, 8  ;;  %s2171_s14 = smul.u32 48, %s3310_s27  ;;  %v483_v54 = vld [vmem:[%s3300_s4 + $0x98] sm:$0xff]  ;;  %v484_v55 = vld [vmem:[%s3300_s4 + $0xa0] sm:$0xff]  ;;  %v485_v59 = vld [vmem:[%s3300_s4 + $0xa8] sm:$0xff] }
  0x10   : > { %s2712_s17 = scalar_lea.vmem %s3298_s2, %s2168_s13  ;;  %508 = vperm.xlu0 %2197, %v466_v4   ;;  %v2216_v57 = vld [vmem:[%s3299_s3 + $0x40] sm:$0xff]   ;;  %v486_v60 = vld [vmem:[%s3300_s4 + $0xb0] sm:$0xff]  ;;  %v2217_v62 = vld [vmem:[%s3299_s3 + $0x48] sm:$0xff]   ;;  %s2167_s13 = sshll.u32 %s3310_s27, 3 }
  0x11   : > { %v1013_v3 = vld [vmem:[%s2712_s17] sm:$0xff]  ;;  %s388_s22 = scalar_lea.vmem %s3296_s0, %s2171_s14  ;;  %v1014_v5 = vld [vmem:[%s2712_s17 + $0x8] sm:$0xff]  ;;  %v1015_v9 = vld [vmem:[%s2712_s17 + $0x10] sm:$0xff]  ;;  %s398_s16 = scalar_lea.vmem %s3297_s1, %s2167_s13 }
  0x12   : > { %1047 = vperm.xlu1 %2198, %v1013_v3   ;;  %v2199_v6 = vld [vmem:[%s388_s22 + $0x4] ss:$8 sps:$4 sm:$0xff]   ;;  %v2201_v7 = vld [vmem:[%s388_s22] ss:$8 sps:$4 sm:$0xff]   ;;  %v2202_v8 = vld [vmem:[%s388_s22 + $0x14] ss:$8 sps:$4 sm:$0xff]   ;;  %s423_s20 = scalar_lea.vmem %s3304_s8, %s2167_s13  ;;  %s413_s27 = scalar_lea.vmem %s3303_s7, %s2167_s13 }
  0x13   : > { %820 = vmatprep.subr.bf16.mxu0 %v2199_v6  ;;  %v2204_v10 = vld [vmem:[%s388_s22 + $0x10] ss:$8 sps:$4 sm:$0xff]   ;;  %v2205_v11 = vld [vmem:[%s388_s22 + $0x24] ss:$8 sps:$4 sm:$0x3f]  }
  0x14   : > { %821 = vmatpush1.bf16.msra.mxu0 %v2201_v7  ;;  %v2207_v12 = vld [vmem:[%s388_s22 + $0x20] ss:$8 sps:$4 sm:$0x3f]   ;;  %1057 = vperm.xlu0 %2197, %v1015_v9   ;;  %v1016_v16 = vld [vmem:[%s2712_s17 + $0x18] sm:$0xff]  ;;  %v1019_v23 = vld [vmem:[%s2712_s17 + $0x30] sm:$0xff] }
  0x15   : > { %822 = vmatprep.subr.bf16.mxu0 %v2202_v8  ;;  %v815_v15 = vsel %vm813_vm0, %v2207_v12, 0  ;;  %v1017_v18 = vld [vmem:[%s2712_s17 + $0x20] sm:$0xff]  ;;  %v1018_v21 = vld [vmem:[%s2712_s17 + $0x28] sm:$0xff]  ;;  %v1020_v26 = vld [vmem:[%s2712_s17 + $0x38] sm:$0xff] }
  0x16   : > { %1052 = vperm.xlu1 %2198, %v1014_v5   ;;  %v1021_v28 = vld [vmem:[%s2712_s17 + $0x40] sm:$0xff]  ;;  %v1022_v31 = vld [vmem:[%s2712_s17 + $0x48] sm:$0xff]  ;;  %v1023_v33 = vld [vmem:[%s2712_s17 + $0x50] sm:$0xff] }
  0x17   : > { %v1024_v36 = vld [vmem:[%s2712_s17 + $0x58] sm:$0xff]  ;;  %v1025_v38 = vld [vmem:[%s2712_s17 + $0x60] sm:$0xff]  ;;  %v1026_v41 = vld [vmem:[%s2712_s17 + $0x68] sm:$0xff] }
  0x18   : > { %823 = vmatpush1.bf16.msra.mxu0 %v2204_v10  ;;  %518 = vperm.xlu0 %2197, %v468_v14   ;;  %v1027_v43 = vld [vmem:[%s2712_s17 + $0x70] sm:$0xff]  ;;  %v1028_v46 = vld [vmem:[%s2712_s17 + $0x78] sm:$0xff]  ;;  %v1029_v48 = vld [vmem:[%s2712_s17 + $0x80] sm:$0xff] }
  0x19   : > { %2083 = vmatprep.subr.msk.bf16.mxu0 %vm813_vm0, %v2205_v11  ;;  %v1030_v51 = vld [vmem:[%s2712_s17 + $0x88] sm:$0xff]  ;;  %v1031_v53 = vld [vmem:[%s2712_s17 + $0x90] sm:$0xff]  ;;  %v1032_v56 = vld [vmem:[%s2712_s17 + $0x98] sm:$0xff] }
  0x1a   : > { %513 = vperm.xlu1 %2198, %v467_v13   ;;  %v1033_v58 = vld [vmem:[%s2712_s17 + $0xa0] sm:$0xff]  ;;  %v1034_v61 = vld [vmem:[%s2712_s17 + $0xa8] sm:$0xff]  ;;  %v1035_v63 = vld [vmem:[%s2712_s17 + $0xb0] sm:$0xff] }
  0x1b   : > { %v487_v0 = vld [vmem:[%s3300_s4 + $0xb8] sm:$0xff]  ;;  %v488_v2 = vld [vmem:[%s3300_s4 + $0xc0] sm:$0xff]  ;;  %v2218_v4 = vld [vmem:[%s3299_s3 + $0x50] sm:$0xff]  }
  0x1c   : > { %825 = vmatpush1.bf16.msra.mxu0 %v815_v15  ;;  %1067 = vperm.xlu0 %2197, %v1017_v18   ;;  %v1036_v3 = vld [vmem:[%s2712_s17 + $0xb8] sm:$0xff]  ;;  %v1037_v5 = vld [vmem:[%s2712_s17 + $0xc0] sm:$0xff]  ;;  %v489_v6 = vld [vmem:[%s3300_s4 + $0xc8] sm:$0xff] }
  0x1d   : > { %v490_v7 = vld [vmem:[%s3300_s4 + $0xd0] sm:$0xff]  ;;  %v1038_v8 = vld [vmem:[%s2712_s17 + $0xc8] sm:$0xff]  ;;  %v2219_v9 = vld [vmem:[%s3299_s3 + $0x58] sm:$0xff]  }
  0x1e   : > { %1062 = vperm.xlu1 %2198, %v1016_v16   ;;  %v1039_v10 = vld [vmem:[%s2712_s17 + $0xd0] sm:$0xff]  ;;  %v491_v11 = vld [vmem:[%s3300_s4 + $0xd8] sm:$0xff]  ;;  %v492_v12 = vld [vmem:[%s3300_s4 + $0xe0] sm:$0xff] }
  0x1f   : > { %2084 = vmatmul.mubr.msk.bf16.vlgmr.msra.gmra.mrb[0].mxu0 %vm764_vm1, %v2208_v17  ;;  %v1040_v13 = vld [vmem:[%s2712_s17 + $0xd8] sm:$0xff]  ;;  %v2220_v14 = vld [vmem:[%s3299_s3 + $0x60] sm:$0xff]   ;;  %v493_v16 = vld [vmem:[%s3300_s4 + $0xe8] sm:$0xff] }
  0x20   : > { %862 = vmatprep.mubr.bf16.mxu0 %v2632_v1  ;;  %528 = vperm.xlu0 %2197, %v470_v20   ;;  %v1041_v15 = vld [vmem:[%s2712_s17 + $0xe0] sm:$0xff]  ;;  %v494_v17 = vld [vmem:[%s3300_s4 + $0xf0] sm:$0xff]  ;;  %v1042_v18 = vld [vmem:[%s2712_s17 + $0xe8] sm:$0xff] }
  0x21   : > { %v1043_v20 = vld [vmem:[%s2712_s17 + $0xf0] sm:$0xff] }
  0x22   : > { %523 = vperm.xlu1 %2198, %v469_v19   ;;  %v2221_v19 = vld [vmem:[%s3299_s3 + $0x68] sm:$0xff]  }
  0x24   : > { %1077 = vperm.xlu0 %2197, %v1019_v23   ;;  %v1044_v23 = vld [vmem:[%s2712_s17 + $0xf8] sm:$0xff] }
  0x26   : > { %1072 = vperm.xlu1 %2198, %v1018_v21   ;;  %v495_v21 = vld [vmem:[%s3300_s4 + $0xf8] sm:$0xff] }
  0x27   : > { %2085 = vmatmul.mubr.msk.bf16.gmra.mrb[4].mxu0 %vm764_vm1, %v2209_v22  ;;  %v1814_v22 = vld [vmem:[%s3302_s6] sm:$0xf] }
  0x28   : > { %872 = vmatprep.mubr.bf16.mxu0 %v2632_v1  ;;  %538 = vperm.xlu0 %2197, %v472_v25   ;;  %v2223_v25 = vld [vmem:[%s3299_s3 + $0x78] sm:$0xff]  }
  0x2a   : > { %533 = vperm.xlu1 %2198, %v471_v24   ;;  %v2222_v24 = vld [vmem:[%s3299_s3 + $0x70] sm:$0xff]  }
  0x2c   : > { %1087 = vperm.xlu0 %2197, %v1021_v28  }
  0x2e   : > { %1082 = vperm.xlu1 %2198, %v1020_v26  }
  0x2f   : > { %2086 = vmatmul.mubr.msk.bf16.gmra.mrb[8].mxu0 %vm764_vm1, %v2210_v27 }
  0x30   : > { %882 = vmatprep.mubr.bf16.mxu0 %v2632_v1  ;;  %548 = vperm.xlu0 %2197, %v474_v30  }
  0x32   : > { %543 = vperm.xlu1 %2198, %v473_v29  }
  0x34   : > { %1097 = vperm.xlu0 %2197, %v1023_v33  }
  0x36   : > { %1092 = vperm.xlu1 %2198, %v1022_v31  }
  0x37   : > { %2087 = vmatmul.mubr.msk.bf16.gmra.mrb[12].mxu0 %vm764_vm1, %v2211_v32 }
  0x38   : > { %892 = vmatprep.mubr.bf16.mxu0 %v2632_v1  ;;  %558 = vperm.xlu0 %2197, %v476_v35  }
  0x3a   : > { %553 = vperm.xlu1 %2198, %v475_v34  }
  0x3c   : > { %1107 = vperm.xlu0 %2197, %v1025_v38  }
  0x3e   : > { %1102 = vperm.xlu1 %2198, %v1024_v36  }
  0x3f   : > { %2088 = vmatmul.mubr.msk.bf16.gmra.mrb[16].mxu0 %vm764_vm1, %v2212_v37 }
  0x40   : > { %902 = vmatprep.mubr.bf16.mxu0 %v2632_v1  ;;  %568 = vperm.xlu0 %2197, %v478_v40  }
  0x42   : > { %563 = vperm.xlu1 %2198, %v477_v39  }
  0x44   : > { %1117 = vperm.xlu0 %2197, %v1027_v43  }
  0x46   : > { %1112 = vperm.xlu1 %2198, %v1026_v41  }
  0x47   : > { %2089 = vmatmul.mubr.msk.bf16.gmra.mrb[20].mxu0 %vm764_vm1, %v2213_v42 }
  0x48   : > { %912 = vmatprep.mubr.bf16.mxu0 %v2632_v1  ;;  %578 = vperm.xlu0 %2197, %v480_v45  }
  0x4a   : > { %573 = vperm.xlu1 %2198, %v479_v44  }
  0x4c   : > { %1127 = vperm.xlu0 %2197, %v1029_v48  }
  0x4e   : > { %1122 = vperm.xlu1 %2198, %v1028_v46  }
  0x4f   : > { %2090 = vmatmul.mubr.msk.bf16.gmra.mrb[24].mxu0 %vm764_vm1, %v2214_v47 }
  0x50   : > { %922 = vmatprep.mubr.bf16.mxu0 %v2632_v1  ;;  %588 = vperm.xlu0 %2197, %v482_v50  }
  0x52   : > { %583 = vperm.xlu1 %2198, %v481_v49  }
  0x54   : > { %1137 = vperm.xlu0 %2197, %v1031_v53  }
  0x56   : > { %1132 = vperm.xlu1 %2198, %v1030_v51  }
  0x57   : > { %2091 = vmatmul.mubr.msk.bf16.gmra.mrb[28].mxu0 %vm764_vm1, %v2215_v52 }
  0x58   : > { %932 = vmatprep.mubr.bf16.mxu0 %v2632_v1  ;;  %598 = vperm.xlu0 %2197, %v484_v55  }
  0x5a   : > { %593 = vperm.xlu1 %2198, %v483_v54  }
  0x5c   : > { %1147 = vperm.xlu0 %2197, %v1033_v58  }
  0x5e   : > { %1142 = vperm.xlu1 %2198, %v1032_v56  }
  0x5f   : > { %2092 = vmatmul.mubr.msk.bf16.gmra.mrb[32].mxu0 %vm764_vm1, %v2216_v57 }
  0x60   : > { %942 = vmatprep.mubr.bf16.mxu0 %v2632_v1  ;;  %608 = vperm.xlu0 %2197, %v486_v60  }
  0x62   : > { %603 = vperm.xlu1 %2198, %v485_v59  }
  0x64   : > { %1157 = vperm.xlu0 %2197, %v1035_v63  }
  0x66   : > { %1152 = vperm.xlu1 %2198, %v1034_v61  }
  0x67   : > { %2093 = vmatmul.mubr.msk.bf16.gmra.mrb[36].mxu0 %vm764_vm1, %v2217_v62 }
  0x68   : > { %952 = vmatprep.mubr.bf16.mxu0 %v2632_v1  ;;  %618 = vperm.xlu0 %2197, %v488_v2  }
  0x6a   : > { %613 = vperm.xlu1 %2198, %v487_v0  }
  0x6c   : > { %1167 = vperm.xlu0 %2197, %v1037_v5  }
  0x6e   : > { %1162 = vperm.xlu1 %2198, %v1036_v3  }
  0x6f   : > { %2094 = vmatmul.mubr.msk.bf16.gmra.mrb[40].mxu0 %vm764_vm1, %v2218_v4 }
  0x70   : > { %962 = vmatprep.mubr.bf16.mxu0 %v2632_v1  ;;  %628 = vperm.xlu0 %2197, %v490_v7  }
  0x72   : > { %623 = vperm.xlu1 %2198, %v489_v6  }
  0x74   : > { %1177 = vperm.xlu0 %2197, %v1039_v10  }
  0x76   : > { %1172 = vperm.xlu1 %2198, %v1038_v8  }
  0x77   : > { %2095 = vmatmul.mubr.msk.bf16.gmra.mrb[44].mxu0 %vm764_vm1, %v2219_v9 }
  0x78   : > { %972 = vmatprep.mubr.bf16.mxu0 %v2632_v1  ;;  %638 = vperm.xlu0 %2197, %v492_v12  }
  0x7a   : > { %633 = vperm.xlu1 %2198, %v491_v11  }
  0x7c   : > { %1187 = vperm.xlu0 %2197, %v1041_v15  }
  0x7e   : > { %1182 = vperm.xlu1 %2198, %v1040_v13  }
  0x7f   : > { %2096 = vmatmul.mubr.msk.bf16.gmra.mrb[48].mxu0 %vm764_vm1, %v2220_v14 }
  0x80   : > { %982 = vmatprep.mubr.bf16.mxu0 %v2632_v1  ;;  %648 = vperm.xlu0 %2197, %v494_v17  }
  0x82   : > { %643 = vperm.xlu1 %2198, %v493_v16  }
  0x84   : > { %1197 = vperm.xlu0 %2197, %v1043_v20  }
  0x86   : > { %1192 = vperm.xlu1 %2198, %v1042_v18  }
  0x87   : > { %2097 = vmatmul.mubr.msk.bf16.gmra.mrb[52].mxu0 %vm764_vm1, %v2221_v19  ;;  %v499_v26 = vpop.permute.xlu0 %498 }
  0x88   : > { %992 = vmatprep.mubr.bf16.mxu0 %v2632_v1  ;;  %1817 = vperm.xlu0 %2197, %v1814_v22  }
  0x8a   : > { %653 = vperm.xlu1 %2198, %v495_v21  }
  0x8b   : > { %v504_v27 = vpop.permute.xlu0 %503 }
  0x8e   : > { %1202 = vperm.xlu1 %2198, %v1044_v23  }
  0x8f   : > { %2098 = vmatmul.mubr.msk.bf16.gmra.mrb[56].mxu0 %vm764_vm1, %v2222_v24  ;;  %v509_v29 = vpop.permute.xlu0 %508 }
  0x90   : > { %1002 = vmatprep.mubr.bf16.mxu0 %v2632_v1 }
  0x91   : > { %v1048_v28 = vpop.permute.xlu1 %1047 }
  0x93   : > { %v1058_v1 = vpop.permute.xlu0 %1057 }
  0x95   : > { %v1053_v30 = vpop.permute.xlu1 %1052 }
  0x97   : > { %2099 = vmatmul.mubr.msk.bf16.gmra.mrb[60].mxu0 %vm764_vm1, %v2223_v25  ;;  %v519_v51 = vpop.permute.xlu0 %518 }
  0x99   : > { %v514_v41 = vpop.permute.xlu1 %513 }
  0x9b   : > { %v1068_v2 = vpop.permute.xlu0 %1067 }
  0x9d   : > { %v1063_v54 = vpop.permute.xlu1 %1062 }
  0x9f   : > { %v529_v20 = vpop.permute.xlu0 %528 }
  0xa1   : > { %v524_v5 = vpop.permute.xlu1 %523 }
  0xa5   : > { %v1073_v24 = vpop.permute.xlu1 %1072 }
  0xf2   : > { %v854_v31 = vpop.f32.mrb[0].mxu0 }
  0xf3   : > { %v855_v32 = vadd.f32 %v854_v31, %v499_v26  ;;  %v856_v33 = vpop.f32.mrb[1].mxu0 }
  0xf4   : > { %v857_v34 = vadd.f32 %v856_v33, %v499_v26  ;;  %v858_v35 = vpop.f32.mrb[2].mxu0 }
  0xf5   : > { %v1205_v36 = vadd.f32 %v1048_v28, %v855_v32  ;;  %v859_v37 = vadd.f32 %v858_v35, %v504_v27  ;;  %v860_v38 = vpop.f32.mrb[3].mxu0 }
  0xf6   : > { %v1206_v39 = vadd.f32 %v1048_v28, %v857_v34  ;;  %v861_v40 = vadd.f32 %v860_v38, %v504_v27 }
  0xf7   : > { %v2100_v42 = vmul.f32 -1.442695, %v1205_v36  ;;  %v1207_v43 = vadd.f32 %v1053_v30, %v859_v37 }
  0xf8   : > { %v2101_v44 = vmul.f32 -1.442695, %v1206_v39  ;;  %v1208_v45 = vadd.f32 %v1053_v30, %v861_v40 }
  0xf9   : > { %2224 = vpow2.f32 %v2100_v42  ;;  %v2102_v46 = vmul.f32 -1.442695, %v1207_v43 }
  0xfa   : > { %2226 = vpow2.f32 %v2101_v44  ;;  %v2103_v47 = vmul.f32 -1.442695, %v1208_v45  ;;  %v864_v48 = vpop.f32.mrb[4].mxu0 }
  0xfb   : > { %v865_v49 = vadd.f32 %v864_v48, %v509_v29  ;;  %v866_v50 = vpop.f32.mrb[5].mxu0  ;;  %2228 = vpow2.f32 %v2102_v46 }
  0xfc   : > { %v867_v52 = vadd.f32 %v866_v50, %v509_v29  ;;  %v868_v53 = vpop.f32.mrb[6].mxu0  ;;  %2230 = vpow2.f32 %v2103_v47 }
  0xfd   : > { %v1209_v55 = vadd.f32 %v1058_v1, %v865_v49  ;;  %v869_v56 = vadd.f32 %v868_v53, %v514_v41  ;;  %v870_v57 = vpop.f32.mrb[7].mxu0  ;;  %2232 = vtanh.f32 %v1205_v36 }
  0xfe   : > { %v1210_v58 = vadd.f32 %v1058_v1, %v867_v52  ;;  %v871_v59 = vadd.f32 %v870_v57, %v514_v41  ;;  %2234 = vtanh.f32 %v1206_v39  ;;  %v1078_v39 = vpop.permute.xlu0 %1077 }
  0xff   : > { %v2104_v60 = vmul.f32 -1.442695, %v1209_v55  ;;  %v1211_v61 = vadd.f32 %v1063_v54, %v869_v56 }
 0x100   : > { %v2105_v62 = vmul.f32 -1.442695, %v1210_v58  ;;  %v2921_v63 = vadd.f32 %v1063_v54, %v871_v59 }
 0x101   : > { %2236 = vpow2.f32 %v2104_v60  ;;  %v2106_v0 = vmul.f32 -1.442695, %v1211_v61 }
 0x102   : > { %2238 = vpow2.f32 %v2105_v62  ;;  %v874_v3 = vpop.f32.mrb[8].mxu0  ;;  %v2107_v9 = vmul.f32 -1.442695, %v2921_v63  ;;  %v539_v59 = vpop.permute.xlu0 %538 }
 0x103   : > { %v2225_v4 = vpop.eup %2224  ;;  %2240 = vtanh.f32 %v1207_v43  ;;  %v875_v6 = vadd.f32 %v874_v3, %v519_v51  ;;  %v876_v7 = vpop.f32.mrb[9].mxu0 }
 0x104   : > { %v2227_v8 = vpop.eup %2226  ;;  %2242 = vpow2.f32 %v2106_v0  ;;  %v877_v10 = vadd.f32 %v876_v7, %v519_v51  ;;  %v878_v11 = vpop.f32.mrb[10].mxu0  ;;  %v1525_v16 = vadd.f32 1.0, %v2225_v4 }
 0x105   : > { %v1526_v12 = vadd.f32 1.0, %v2227_v8  ;;  %2244 = vtanh.f32 %v1208_v45  ;;  %v2924_v13 = vadd.f32 %v1068_v2, %v875_v6  ;;  %v880_v14 = vpop.f32.mrb[11].mxu0  ;;  %v2229_v15 = vpop.eup %2228  ;;  %v879_v18 = vadd.f32 %v878_v11, %v524_v5 }
 0x106   : > { %2246 = vtanh.f32 %v1209_v55  ;;  %v1527_v17 = vadd.f32 1.0, %v2229_v15  ;;  %v2231_v19 = vpop.eup %2230  ;;  %v2927_v22 = vadd.f32 %v1068_v2, %v877_v10  ;;  %v881_v27 = vadd.f32 %v880_v14, %v524_v5  ;;  %v534_v43 = vpop.permute.xlu1 %533 }
 0x107   : > { %2248 = vrcp.f32 %v1526_v12  ;;  %v2108_v21 = vmul.f32 -1.442695, %v2924_v13  ;;  %v2929_v23 = vpop.eup %2232  ;;  %v1528_v25 = vadd.f32 1.0, %v2231_v19  ;;  %v2931_v30 = vadd.f32 %v1073_v24, %v879_v18 }
 0x108   : > { %2250 = vpow2.f32 %v2107_v9  ;;  %v2235_v26 = vpop.eup %2234  ;;  %v2109_v34 = vmul.f32 -1.442695, %v2927_v22  ;;  %v2934_v41 = vadd.f32 %v1073_v24, %v881_v27 }
 0x109   : > { %2252 = vrcp.f32 %v1527_v17  ;;  %v2110_v45 = vmul.f32 -1.442695, %v2931_v30 }
 0x10a   : > { %2254 = vrcp.f32 %v1525_v16  ;;  %v884_v28 = vpop.f32.mrb[12].mxu0  ;;  %v2111_v51 = vmul.f32 -1.442695, %v2934_v41  ;;  %v1083_v0 = vpop.permute.xlu1 %1082 }
 0x10b   : > { %v2237_v29 = vpop.eup %2236  ;;  %2256 = vrcp.f32 %v1528_v25  ;;  %v886_v31 = vpop.f32.mrb[13].mxu0  ;;  %v885_v35 = vadd.f32 %v884_v28, %v529_v20 }
 0x10c   : > { %v2239_v32 = vpop.eup %2238  ;;  %v1529_v33 = vadd.f32 1.0, %v2237_v29  ;;  %2258 = vpow2.f32 %v2108_v21  ;;  %v888_v36 = vpop.f32.mrb[14].mxu0  ;;  %v887_v46 = vadd.f32 %v886_v31, %v529_v20 }
 0x10d   : > { %v2241_v37 = vpop.eup %2240  ;;  %2260 = vtanh.f32 %v1210_v58  ;;  %v890_v38 = vpop.f32.mrb[15].mxu0  ;;  %v1530_v40 = vadd.f32 1.0, %v2239_v32  ;;  %v2939_v48 = vadd.f32 %v1078_v39, %v885_v35  ;;  %v889_v52 = vadd.f32 %v888_v36, %v534_v43 }
 0x10e   : > { %v2243_v1 = vpop.eup %2242  ;;  %2262 = vtanh.f32 %v1211_v61  ;;  %v2942_v56 = vadd.f32 %v1078_v39, %v887_v46  ;;  %v891_v2 = vadd.f32 %v890_v38, %v534_v43  ;;  %v1088_v20 = vpop.permute.xlu0 %1087 }
 0x10f   : > { %v2245_v42 = vpop.eup %2244  ;;  %2264 = vrcp.f32 %v1529_v33  ;;  %v1531_v44 = vadd.f32 1.0, %v2243_v1  ;;  %v2112_v60 = vmul.f32 -1.442695, %v2939_v48  ;;  %v2946_v6 = vadd.f32 %v1083_v0, %v889_v52  ;;  %v544_v24 = vpop.permute.xlu1 %543 }
 0x110   : > { %v2937_v47 = vpop.eup %2246  ;;  %2266 = vpow2.f32 %v2109_v34  ;;  %v2952_v17 = vadd.f32 %v1083_v0, %v891_v2 }
 0x111   : > { %v2249_v49 = vpop.eup %2248  ;;  %2268 = vrcp.f32 %v1531_v44 }
 0x112   : > { %v2251_v50 = vpop.eup %2250  ;;  %2270 = vrcp.f32 %v1530_v40  ;;  %v894_v53 = vpop.f32.mrb[16].mxu0  ;;  %v1718_v7 = vmul.f32 %v2249_v49, %v2235_v26  ;;  %v2115_v32 = vmul.f32 -1.442695, %v2952_v17 }
 0x113   : > { %v2253_v54 = vpop.eup %2252  ;;  %v1532_v55 = vadd.f32 1.0, %v2251_v50  ;;  %2272 = vpow2.f32 %v2110_v45  ;;  %v896_v57 = vpop.f32.mrb[17].mxu0  ;;  %v895_v12 = vadd.f32 %v894_v53, %v539_v59 }
 0x114   : > { %v2255_v58 = vpop.eup %2254  ;;  %2274 = vtanh.f32 %v2921_v63  ;;  %v898_v61 = vpop.f32.mrb[18].mxu0  ;;  %v1719_v4 = vmul.f32 %v2253_v54, %v2241_v37  ;;  %v2113_v63 = vmul.f32 -1.442695, %v2942_v56  ;;  %v897_v26 = vadd.f32 %v896_v57, %v539_v59 }
 0x115   : > { %v2257_v62 = vpop.eup %2256  ;;  %2276 = vrcp.f32 %v1532_v55  ;;  %v900_v3 = vpop.f32.mrb[19].mxu0  ;;  %v1717_v10 = vmul.f32 %v2255_v58, %v2929_v23  ;;  %v899_v37 = vadd.f32 %v898_v61, %v544_v24 }
 0x116   : > { %v2259_v5 = vpop.eup %2258  ;;  %2278 = vpow2.f32 %v2111_v51  ;;  %v1720_v8 = vmul.f32 %v2257_v62, %v2245_v42  ;;  %v2965_v1 = vadd.f32 %v1088_v20, %v897_v26  ;;  %v1093_v46 = vpop.permute.xlu1 %1092 }
 0x117   : > { %v2261_v9 = vpop.eup %2260  ;;  %2280 = vtanh.f32 %v2924_v13  ;;  %v1533_v16 = vadd.f32 1.0, %v2259_v5  ;;  %v1782_v18 = vpack.c.bf16 %v1719_v4, %v1717_v10  ;;  %v2114_v13 = vmul.f32 -1.442695, %v2946_v6 }
 0x118   : > { %v2263_v11 = vpop.eup %2262  ;;  %2282 = vpow2.f32 %v2112_v60  ;;  %v1783_v14 = vpack.c.bf16 %v1720_v8, %v1718_v7  ;;  %v2969_v51 = vadd.f32 %v1093_v46, %v899_v37  ;;  %v2117_v55 = vmul.f32 -1.442695, %v2965_v1 }
 0x119   : > { %v2265_v15 = vpop.eup %2264  ;;  %2284 = vtanh.f32 %v2927_v22  ;;  %v2957_v22 = vadd.f32 %v1088_v20, %v895_v12 }
 0x11a   : > { %v2267_v19 = vpop.eup %2266  ;;  %2286 = vtanh.f32 %v2931_v30  ;;  %1831 = vmatprep.subr.bf16.mxu1 %v1783_v14  ;;  %v904_v21 = vpop.f32.mrb[20].mxu0  ;;  %v1721_v34 = vmul.f32 %v2265_v15, %v2937_v47  ;;  %v901_v47 = vadd.f32 %v900_v3, %v544_v24  ;;  %v2118_v4 = vmul.f32 -1.442695, %v2969_v51 }
 0x11b   : > { %v2269_v23 = vpop.eup %2268  ;;  %v1534_v25 = vadd.f32 1.0, %v2267_v19  ;;  %2288 = vpow2.f32 %v2113_v63  ;;  %1832 = vmatpush1.bf16.msra.mxu1 %v1782_v18  ;;  %v906_v27 = vpop.f32.mrb[21].mxu0  ;;  %v2116_v42 = vmul.f32 -1.442695, %v2957_v22 }
 0x11c   : > { %v2271_v28 = vpop.eup %2270  ;;  %2290 = vtanh.f32 %v2934_v41  ;;  %v2959_v29 = vpop.f32.mrb[22].mxu0  ;;  %v1723_v31 = vmul.f32 %v2269_v23, %v2263_v11 }
 0x11d   : > { %v2273_v30 = vpop.eup %2272  ;;  %2292 = vrcp.f32 %v1533_v16  ;;  %v2962_v33 = vpop.f32.mrb[23].mxu0  ;;  %v1722_v43 = vmul.f32 %v2271_v28, %v2261_v9 }
 0x11e   : > { %v2275_v35 = vpop.eup %2274  ;;  %v1535_v36 = vadd.f32 1.0, %v2273_v30  ;;  %2294 = vpow2.f32 %v2114_v13  ;;  %v1784_v39 = vpack.c.bf16 %v1723_v31, %v1721_v34  ;;  %v549_v41 = vpop.permute.xlu0 %548 }
 0x11f   : > { %v2277_v38 = vpop.eup %2276  ;;  %2296 = vrcp.f32 %v1534_v25  ;;  %v905_v59 = vadd.f32 %v904_v21, %v549_v41  ;;  %v554_v7 = vpop.permute.xlu1 %553  ;;  %v907_v8 = vadd.f32 %v906_v27, %v549_v41 }
 0x120   : > { %v2279_v40 = vpop.eup %2278  ;;  %2298 = vrcp.f32 %v1535_v36  ;;  %v1724_v44 = vmul.f32 %v2277_v38, %v2275_v35  ;;  %v911_v28 = vadd.f32 %v2962_v33, %v554_v7 }
 0x121   : > { %v2281_v45 = vpop.eup %2280  ;;  %v1536_v49 = vadd.f32 1.0, %v2279_v40  ;;  %2300 = vpow2.f32 %v2115_v32 }
 0x122   : > { %v2283_v50 = vpop.eup %2282  ;;  %2302 = vtanh.f32 %v2939_v48  ;;  %v1785_v52 = vpack.c.bf16 %v1724_v44, %v1722_v43  ;;  %v2971_v53 = vpop.f32.mrb[24].mxu0  ;;  %v2979_v48 = vadd.f32 %v1093_v46, %v901_v47 }
 0x123   : > { %v2285_v54 = vpop.eup %2284  ;;  %2304 = vrcp.f32 %v1536_v49  ;;  %v2974_v57 = vpop.f32.mrb[25].mxu0  ;;  %v1537_v62 = vadd.f32 1.0, %v2283_v50 }
 0x124   : > { %v2287_v58 = vpop.eup %2286  ;;  %2306 = vpow2.f32 %v2116_v42  ;;  %1833 = vmatprep.subr.bf16.mxu1 %v1785_v52  ;;  %v2976_v60 = vpop.f32.mrb[26].mxu0  ;;  %v2119_v12 = vmul.f32 -1.442695, %v2979_v48 }
 0x125   : > { %v2289_v61 = vpop.eup %2288  ;;  %2308 = vtanh.f32 %v2942_v56  ;;  %1834 = vmatpush1.bf16.msra.mxu1 %v1784_v39  ;;  %v2981_v0 = vpop.f32.mrb[27].mxu0 }
 0x126   : > { %v2291_v2 = vpop.eup %2290  ;;  %v1098_v3 = vpop.permute.xlu0 %1097  ;;  %2310 = vtanh.f32 %v2946_v6  ;;  %v1538_v63 = vadd.f32 1.0, %v2289_v61  ;;  %v909_v6 = vadd.f32 %v2959_v29, %v554_v7 }
 0x127   : > { %v2293_v5 = vpop.eup %2292  ;;  %2312 = vpow2.f32 %v2117_v55  ;;  %v2986_v56 = vadd.f32 %v1098_v3, %v905_v59  ;;  %v2992_v18 = vadd.f32 %v1098_v3, %v907_v8  ;;  %v1103_v27 = vpop.permute.xlu1 %1102 }
 0x128   : > { %v2295_v9 = vpop.eup %2294  ;;  %2314 = vtanh.f32 %v2952_v17  ;;  %v1725_v19 = vmul.f32 %v2293_v5, %v2281_v45  ;;  %v3002_v32 = vadd.f32 %v1103_v27, %v909_v6  ;;  %v3008_v42 = vadd.f32 %v1103_v27, %v911_v28 }
 0x129   : > { %v2297_v10 = vpop.eup %2296  ;;  %2316 = vrcp.f32 %v1537_v62  ;;  %v1539_v11 = vadd.f32 1.0, %v2295_v9  ;;  %v2120_v24 = vmul.f32 -1.442695, %v2986_v56  ;;  %v2121_v37 = vmul.f32 -1.442695, %v2992_v18 }
 0x12a   : > { %v2299_v14 = vpop.eup %2298  ;;  %2318 = vpow2.f32 %v2118_v4  ;;  %v2990_v15 = vpop.f32.mrb[28].mxu0  ;;  %v1726_v34 = vmul.f32 %v2297_v10, %v2285_v54  ;;  %v2122_v45 = vmul.f32 -1.442695, %v3002_v32 }
 0x12b   : > { %v2301_v16 = vpop.eup %2300  ;;  %2320 = vrcp.f32 %v1539_v11  ;;  %v1727_v20 = vmul.f32 %v2299_v14, %v2287_v58  ;;  %v2994_v17 = vpop.f32.mrb[29].mxu0  ;;  %v2123_v58 = vmul.f32 -1.442695, %v3008_v42 }
 0x12c   : > { %v2303_v13 = vpop.eup %2302  ;;  %v559_v21 = vpop.permute.xlu0 %558  ;;  %2322 = vrcp.f32 %v1538_v63  ;;  %v1540_v23 = vadd.f32 1.0, %v2301_v16 }
 0x12d   : > { %v2997_v25 = vpop.f32.mrb[30].mxu0  ;;  %v2305_v26 = vpop.eup %2304  ;;  %2324 = vpow2.f32 %v2119_v12  ;;  %v1786_v29 = vpack.c.bf16 %v1727_v20, %v1725_v19  ;;  %v915_v39 = vadd.f32 %v2971_v53, %v559_v21  ;;  %v917_v47 = vadd.f32 %v2974_v57, %v559_v21 }
 0x12e   : > { %v3000_v31 = vpop.f32.mrb[31].mxu0  ;;  %v2307_v30 = vpop.eup %2306  ;;  %2326 = vrcp.f32 %v1540_v23  ;;  %v1728_v35 = vmul.f32 %v2305_v26, %v2291_v2 }
 0x12f   : > { %v2309_v36 = vpop.eup %2308  ;;  %2328 = vtanh.f32 %v2957_v22  ;;  %v1541_v41 = vadd.f32 1.0, %v2307_v30  ;;  %v564_v49 = vpop.permute.xlu1 %563 }
 0x130   : > { %v2311_v38 = vpop.eup %2310  ;;  %2330 = vpow2.f32 %v2120_v24  ;;  %v1787_v40 = vpack.c.bf16 %v1728_v35, %v1726_v34  ;;  %v1108_v44 = vpop.permute.xlu0 %1107  ;;  %v919_v57 = vadd.f32 %v2976_v60, %v564_v49  ;;  %v921_v11 = vadd.f32 %v2981_v0, %v564_v49 }
 0x131   : > { %v2313_v33 = vpop.eup %2312  ;;  %2332 = vtanh.f32 %v2965_v1  ;;  %v3018_v53 = vadd.f32 %v1108_v44, %v915_v39 }
 0x132   : > { %v2315_v43 = vpop.eup %2314  ;;  %2334 = vtanh.f32 %v2969_v51  ;;  %1835 = vmatprep.subr.bf16.mxu1 %v1787_v40  ;;  %v3012_v22 = vpop.f32.mrb[32].mxu0  ;;  %v1542_v52 = vadd.f32 1.0, %v2313_v33 }
 0x133   : > { %v2317_v46 = vpop.eup %2316  ;;  %2336 = vpow2.f32 %v2121_v37  ;;  %1836 = vmatpush1.bf16.msra.mxu1 %v1786_v29  ;;  %v3015_v50 = vpop.f32.mrb[33].mxu0  ;;  %v2124_v8 = vmul.f32 -1.442695, %v3018_v53 }
 0x134   : > { %v2319_v1 = vpop.eup %2318  ;;  %2338 = vtanh.f32 %v2979_v48  ;;  %v3020_v51 = vpop.f32.mrb[34].mxu0  ;;  %v1729_v62 = vmul.f32 %v2317_v46, %v2303_v13  ;;  %v3026_v48 = vadd.f32 %v1108_v44, %v917_v47 }
 0x135   : > { %v2321_v54 = vpop.eup %2320  ;;  %2340 = vrcp.f32 %v1541_v41  ;;  %v1543_v55 = vadd.f32 1.0, %v2319_v1  ;;  %v3023_v59 = vpop.f32.mrb[35].mxu0 }
 0x136   : > { %v2323_v61 = vpop.eup %2322  ;;  %2342 = vpow2.f32 %v2122_v45  ;;  %v1731_v2 = vmul.f32 %v2321_v54, %v2311_v38  ;;  %v569_v5 = vpop.permute.xlu0 %568  ;;  %v2125_v20 = vmul.f32 -1.442695, %v3026_v48 }
 0x137   : > { %v2325_v3 = vpop.eup %2324  ;;  %2344 = vrcp.f32 %v1543_v55  ;;  %v1113_v10 = vpop.permute.xlu1 %1112  ;;  %v1730_v12 = vmul.f32 %v2323_v61, %v2309_v36  ;;  %v925_v0 = vadd.f32 %v2990_v15, %v569_v5  ;;  %v927_v36 = vadd.f32 %v2994_v17, %v569_v5 }
 0x138   : > { %v2327_v4 = vpop.eup %2326  ;;  %2346 = vrcp.f32 %v1542_v52  ;;  %v1544_v7 = vadd.f32 1.0, %v2325_v3  ;;  %v1788_v9 = vpack.c.bf16 %v1731_v2, %v1729_v62  ;;  %v3030_v6 = vadd.f32 %v1113_v10, %v919_v57 }
 0x139   : > { %v2329_v63 = vpop.eup %2328  ;;  %2348 = vpow2.f32 %v2123_v58  ;;  %v1732_v60 = vmul.f32 %v2327_v4, %v2315_v43  ;;  %v3042_v28 = vadd.f32 %v1113_v10, %v921_v11 }
 0x13a   : > { %v2331_v14 = vpop.eup %2330  ;;  %2350 = vrcp.f32 %v1544_v7  ;;  %v3032_v16 = vpop.f32.mrb[36].mxu0  ;;  %v2126_v34 = vmul.f32 -1.442695, %v3030_v6 }
 0x13b   : > { %v2333_v19 = vpop.eup %2332  ;;  %2352 = vtanh.f32 %v2986_v56  ;;  %v1789_v13 = vpack.c.bf16 %v1732_v60, %v1730_v12  ;;  %v3036_v21 = vpop.f32.mrb[37].mxu0  ;;  %v1545_v27 = vadd.f32 1.0, %v2331_v14  ;;  %v2127_v33 = vmul.f32 -1.442695, %v3042_v28 }
 0x13c   : > { %v2335_v23 = vpop.eup %2334  ;;  %2354 = vpow2.f32 %v2124_v8  ;;  %v3039_v24 = vpop.f32.mrb[38].mxu0 }
 0x13d   : > { %v2337_v26 = vpop.eup %2336  ;;  %2356 = vtanh.f32 %v2992_v18  ;;  %1837 = vmatprep.subr.bf16.mxu1 %v1789_v13  ;;  %v3044_v29 = vpop.f32.mrb[39].mxu0 }
 0x13e   : > { %v2339_v56 = vpop.eup %2338  ;;  %v1118_v30 = vpop.permute.xlu0 %1117  ;;  %2358 = vtanh.f32 %v3002_v32  ;;  %1838 = vmatpush1.bf16.msra.mxu1 %v1788_v9  ;;  %v1546_v38 = vadd.f32 1.0, %v2337_v26 }
 0x13f   : > { %v2341_v35 = vpop.eup %2340  ;;  %v574_v15 = vpop.permute.xlu1 %573  ;;  %2360 = vpow2.f32 %v2125_v20  ;;  %v3050_v18 = vadd.f32 %v1118_v30, %v925_v0  ;;  %v3056_v46 = vadd.f32 %v1118_v30, %v927_v36 }
 0x140   : > { %v2343_v37 = vpop.eup %2342  ;;  %2362 = vtanh.f32 %v3008_v42  ;;  %v929_v41 = vadd.f32 %v2997_v25, %v574_v15  ;;  %v1733_v43 = vmul.f32 %v2341_v35, %v2329_v63  ;;  %v931_v61 = vadd.f32 %v3000_v31, %v574_v15 }
 0x141   : > { %v2345_v39 = vpop.eup %2344  ;;  %2364 = vrcp.f32 %v1545_v27  ;;  %v1547_v40 = vadd.f32 1.0, %v2343_v37  ;;  %v2128_v52 = vmul.f32 -1.442695, %v3050_v18  ;;  %v2129_v7 = vmul.f32 -1.442695, %v3056_v46 }
 0x142   : > { %v2347_v32 = vpop.eup %2346  ;;  %2366 = vpow2.f32 %v2126_v34  ;;  %v1735_v44 = vmul.f32 %v2345_v39, %v2335_v23  ;;  %v3054_v45 = vpop.f32.mrb[40].mxu0 }
 0x143   : > { %v2349_v17 = vpop.eup %2348  ;;  %2368 = vrcp.f32 %v1547_v40  ;;  %v3058_v42 = vpop.f32.mrb[41].mxu0  ;;  %v1734_v57 = vmul.f32 %v2347_v32, %v2333_v19 }
 0x144   : > { %v2351_v49 = vpop.eup %2350  ;;  %v579_v47 = vpop.permute.xlu0 %578  ;;  %2370 = vrcp.f32 %v1546_v38  ;;  %v1548_v1 = vadd.f32 1.0, %v2349_v17  ;;  %v1790_v54 = vpack.c.bf16 %v1735_v44, %v1733_v43 }
 0x145   : > { %v3061_v55 = vpop.f32.mrb[42].mxu0  ;;  %v2353_v25 = vpop.eup %2352  ;;  %2372 = vpow2.f32 %v2127_v33  ;;  %v1736_v62 = vmul.f32 %v2351_v49, %v2339_v56  ;;  %v935_v63 = vadd.f32 %v3012_v22, %v579_v47  ;;  %v937_v22 = vadd.f32 %v3015_v50, %v579_v47 }
 0x146   : > { %v1123_v58 = vpop.permute.xlu1 %1122  ;;  %v3064_v2 = vpop.f32.mrb[43].mxu0  ;;  %2374 = vrcp.f32 %v1548_v1 }
 0x147   : > { %v2355_v3 = vpop.eup %2354  ;;  %v3066_v4 = vadd.f32 %v1123_v58, %v929_v41  ;;  %2376 = vtanh.f32 %v3018_v53  ;;  %v1791_v8 = vpack.c.bf16 %v1736_v62, %v1734_v57  ;;  %v3072_v11 = vadd.f32 %v1123_v58, %v931_v61 }
 0x148   : > { %v2357_v5 = vpop.eup %2356  ;;  %2378 = vpow2.f32 %v2128_v52  ;;  %v1549_v31 = vadd.f32 1.0, %v2355_v3  ;;  %v1128_v60 = vpop.permute.xlu0 %1127 }
 0x149   : > { %v2359_v9 = vpop.eup %2358  ;;  %2380 = vtanh.f32 %v3026_v48  ;;  %1839 = vmatprep.subr.bf16.mxu1 %v1791_v8  ;;  %v2130_v53 = vmul.f32 -1.442695, %v3066_v4  ;;  %v3082_v0 = vadd.f32 %v1128_v60, %v935_v63  ;;  %v2131_v56 = vmul.f32 -1.442695, %v3072_v11 }
 0x14a   : > { %v2361_v10 = vpop.eup %2360  ;;  %2382 = vtanh.f32 %v3030_v6  ;;  %1840 = vmatpush1.bf16.msra.mxu1 %v1790_v54  ;;  %v3076_v14 = vpop.f32.mrb[44].mxu0  ;;  %v3095_v37 = vadd.f32 %v1128_v60, %v937_v22 }
 0x14b   : > { %v2363_v12 = vpop.eup %2362  ;;  %v584_v20 = vpop.permute.xlu1 %583  ;;  %2384 = vpow2.f32 %v2129_v7  ;;  %v1550_v23 = vadd.f32 1.0, %v2361_v10 }
 0x14c   : > { %v2365_v19 = vpop.eup %2364  ;;  %v3079_v13 = vpop.f32.mrb[45].mxu0  ;;  %2386 = vtanh.f32 %v3042_v28  ;;  %v939_v50 = vadd.f32 %v3020_v51, %v584_v20  ;;  %v3093_v28 = vld.sshfl [vmem:[%s3301_s5] sm:$0x33 pattern:$0x76325410]  ;;  %v941_v44 = vadd.f32 %v3023_v59, %v584_v20 }
 0x14d   : > { %v2367_v48 = vpop.eup %2366  ;;  %v3084_v26 = vpop.f32.mrb[46].mxu0  ;;  %2388 = vrcp.f32 %v1549_v31  ;;  %v1737_v35 = vmul.f32 %v2365_v19, %v2353_v25  ;;  %v1828_v38 = vcombine.high %v3093_v28, %v3093_v28  ;;  %v2132_v51 = vmul.f32 -1.442695, %v3082_v0 }
 0x14e   : > { %v2369_v6 = vpop.eup %2368  ;;  %v1551_v27 = vadd.f32 1.0, %v2367_v48  ;;  %v3087_v30 = vpop.f32.mrb[47].mxu0  ;;  %2390 = vpow2.f32 %v2130_v53  ;;  %v2133_v25 = vmul.f32 -1.442695, %v3095_v37 }
 0x14f   : > { %v2371_v34 = vpop.eup %2370  ;;  %v1739_v15 = vmul.f32 %v2369_v6, %v2359_v9  ;;  %v589_v40 = vpop.permute.xlu0 %588  ;;  %1863 = vmatprep.mubr.bf16.mxu1 %v1828_v38 }
 0x150   : > { %v2373_v36 = vpop.eup %2372  ;;  %2392 = vrcp.f32 %v1551_v27  ;;  %v1133_v43 = vpop.permute.xlu1 %1132  ;;  %v1738_v17 = vmul.f32 %v2371_v34, %v2357_v5  ;;  %v945_v59 = vadd.f32 %v3032_v16, %v589_v40  ;;  %v947_v31 = vadd.f32 %v3036_v21, %v589_v40 }
 0x151   : > { %v2375_v39 = vpop.eup %2374  ;;  %2394 = vrcp.f32 %v1550_v23  ;;  %v1552_v33 = vadd.f32 1.0, %v2373_v36  ;;  %v1792_v32 = vpack.c.bf16 %v1739_v15, %v1737_v35  ;;  %v3101_v1 = vadd.f32 %v1133_v43, %v939_v50 }
 0x152   : > { %v2377_v41 = vpop.eup %2376  ;;  %2396 = vpow2.f32 %v2131_v56  ;;  %v1740_v49 = vmul.f32 %v2375_v39, %v2363_v12  ;;  %v3103_v52 = vpop.f32.mrb[48].mxu0  ;;  %v3113_v7 = vadd.f32 %v1133_v43, %v941_v44 }
 0x153   : > { %v2379_v47 = vpop.eup %2378  ;;  %2398 = vrcp.f32 %v1552_v33  ;;  %v3107_v61 = vpop.f32.mrb[49].mxu0  ;;  %v2134_v63 = vmul.f32 -1.442695, %v3101_v1 }
 0x154   : > { %v2381_v54 = vpop.eup %2380  ;;  %2400 = vtanh.f32 %v3050_v18  ;;  %v1793_v58 = vpack.c.bf16 %v1740_v49, %v1738_v17  ;;  %v3110_v62 = vpop.f32.mrb[50].mxu0  ;;  %v1553_v5 = vadd.f32 1.0, %v2379_v47  ;;  %v2135_v20 = vmul.f32 -1.442695, %v3113_v7 }
 0x155   : > { %v2383_v57 = vpop.eup %2382  ;;  %2402 = vpow2.f32 %v2132_v51  ;;  %v3115_v8 = vpop.f32.mrb[51].mxu0 }
 0x156   : > { %v2385_v3 = vpop.eup %2384  ;;  %2404 = vtanh.f32 %v3056_v46  ;;  %1841 = vmatprep.subr.bf16.mxu1 %v1793_v58  ;;  %v1138_v9 = vpop.permute.xlu0 %1137 }
 0x157   : > { %v2387_v18 = vpop.eup %2386  ;;  %2406 = vtanh.f32 %v3066_v4  ;;  %1842 = vmatpush1.bf16.msra.mxu1 %v1792_v32  ;;  %v594_v16 = vpop.permute.xlu1 %593  ;;  %v1554_v60 = vadd.f32 1.0, %v2385_v3  ;;  %v3121_v46 = vadd.f32 %v1138_v9, %v945_v59  ;;  %v3127_v27 = vadd.f32 %v1138_v9, %v947_v31 }
 0x158   : > { %v2389_v10 = vpop.eup %2388  ;;  %2408 = vpow2.f32 %v2133_v25  ;;  %v949_v22 = vadd.f32 %v3039_v24, %v594_v16  ;;  %v951_v39 = vadd.f32 %v3044_v29, %v594_v16 }
 0x159   : > { %v2391_v12 = vpop.eup %2390  ;;  %2410 = vtanh.f32 %v3072_v11  ;;  %v1741_v48 = vmul.f32 %v2389_v10, %v2377_v41  ;;  %v2136_v35 = vmul.f32 -1.442695, %v3121_v46  ;;  %v2137_v44 = vmul.f32 -1.442695, %v3127_v27 }
 0x15a   : > { %v2393_v53 = vpop.eup %2392  ;;  %2412 = vrcp.f32 %v1553_v5  ;;  %v1555_v19 = vadd.f32 1.0, %v2391_v12  ;;  %v3125_v6 = vpop.f32.mrb[52].mxu0 }
 0x15b   : > { %v2395_v4 = vpop.eup %2394  ;;  %2414 = vpow2.f32 %v2134_v63  ;;  %v1743_v23 = vmul.f32 %v2393_v53, %v2383_v57  ;;  %v3129_v11 = vpop.f32.mrb[53].mxu0 }
 0x15c   : > { %v2397_v21 = vpop.eup %2396  ;;  %2416 = vrcp.f32 %v1555_v19  ;;  %v599_v34 = vpop.permute.xlu0 %598  ;;  %v1742_v40 = vmul.f32 %v2395_v4, %v2381_v54 }
 0x15d   : > { %v2399_v56 = vpop.eup %2398  ;;  %2418 = vrcp.f32 %v1554_v60  ;;  %v1556_v50 = vadd.f32 1.0, %v2397_v21  ;;  %v1794_v15 = vpack.c.bf16 %v1743_v23, %v1741_v48  ;;  %v3132_v36 = vpop.f32.mrb[54].mxu0  ;;  %v955_v47 = vadd.f32 %v3054_v45, %v599_v34 }
 0x15e   : > { %v2401_v24 = vpop.eup %2400  ;;  %v1143_v38 = vpop.permute.xlu1 %1142  ;;  %2420 = vpow2.f32 %v2135_v20  ;;  %v1744_v33 = vmul.f32 %v2399_v56, %v2387_v18  ;;  %v957_v45 = vadd.f32 %v3058_v42, %v599_v34 }
 0x15f   : > { %v3135_v51 = vpop.f32.mrb[55].mxu0  ;;  %v2403_v32 = vpop.eup %2402  ;;  %2422 = vrcp.f32 %v1556_v50  ;;  %v3137_v41 = vadd.f32 %v1143_v38, %v949_v22  ;;  %v3143_v54 = vadd.f32 %v1143_v38, %v951_v39 }
 0x160   : > { %v2405_v43 = vpop.eup %2404  ;;  %2424 = vtanh.f32 %v3082_v0  ;;  %v1795_v17 = vpack.c.bf16 %v1744_v33, %v1742_v40  ;;  %v1557_v29 = vadd.f32 1.0, %v2403_v32  ;;  %v1148_v57 = vpop.permute.xlu0 %1147 }
 0x161   : > { %v2407_v49 = vpop.eup %2406  ;;  %2426 = vpow2.f32 %v2136_v35  ;;  %v2138_v0 = vmul.f32 -1.442695, %v3137_v41  ;;  %v3153_v63 = vadd.f32 %v1148_v57, %v955_v47  ;;  %v2139_v31 = vmul.f32 -1.442695, %v3143_v54 }
 0x162   : > { %v2409_v25 = vpop.eup %2408  ;;  %2428 = vtanh.f32 %v3095_v37  ;;  %1843 = vmatprep.subr.bf16.mxu1 %v1795_v17  ;;  %v3147_v59 = vpop.f32.mrb[56].mxu0 }
 0x163   : > { %v2411_v58 = vpop.eup %2410  ;;  %2430 = vtanh.f32 %v3101_v1  ;;  %1844 = vmatpush1.bf16.msra.mxu1 %v1794_v15  ;;  %v604_v5 = vpop.permute.xlu1 %603  ;;  %v1558_v9 = vadd.f32 1.0, %v2409_v25  ;;  %v2140_v48 = vmul.f32 -1.442695, %v3153_v63 }
 0x164   : > { %v2413_v3 = vpop.eup %2412  ;;  %2432 = vpow2.f32 %v2137_v44  ;;  %v3150_v18 = vpop.f32.mrb[57].mxu0  ;;  %v959_v42 = vadd.f32 %v3061_v55, %v604_v5  ;;  %v961_v50 = vadd.f32 %v3064_v2, %v604_v5 }
 0x165   : > { %v2415_v37 = vpop.eup %2414  ;;  %2434 = vtanh.f32 %v3113_v7  ;;  %v3155_v10 = vpop.f32.mrb[58].mxu0  ;;  %v1745_v53 = vmul.f32 %v2413_v3, %v2401_v24  ;;  %v3161_v7 = vadd.f32 %v1148_v57, %v957_v45 }
 0x166   : > { %v2417_v1 = vpop.eup %2416  ;;  %2436 = vrcp.f32 %v1557_v29  ;;  %v1559_v16 = vadd.f32 1.0, %v2415_v37  ;;  %v3158_v12 = vpop.f32.mrb[59].mxu0 }
 0x167   : > { %v2419_v60 = vpop.eup %2418  ;;  %2438 = vpow2.f32 %v2138_v0  ;;  %v1747_v19 = vmul.f32 %v2417_v1, %v2407_v49  ;;  %v609_v56 = vpop.permute.xlu0 %608  ;;  %v2141_v40 = vmul.f32 -1.442695, %v3161_v7 }
 0x168   : > { %v2421_v20 = vpop.eup %2420  ;;  %2440 = vrcp.f32 %v1559_v16  ;;  %v1153_v34 = vpop.permute.xlu1 %1152  ;;  %v1746_v35 = vmul.f32 %v2419_v60, %v2405_v43  ;;  %v965_v2 = vadd.f32 %v3076_v14, %v609_v56  ;;  %v967_v0 = vadd.f32 %v3079_v13, %v609_v56 }
 0x169   : > { %v2423_v4 = vpop.eup %2422  ;;  %2442 = vrcp.f32 %v1558_v9  ;;  %v1560_v22 = vadd.f32 1.0, %v2421_v20  ;;  %v1796_v23 = vpack.c.bf16 %v1747_v19, %v1745_v53  ;;  %v3165_v24 = vadd.f32 %v1153_v34, %v959_v42 }
 0x16a   : > { %v2425_v21 = vpop.eup %2424  ;;  %2444 = vpow2.f32 %v2139_v31  ;;  %v1748_v55 = vmul.f32 %v2423_v4, %v2411_v58  ;;  %v3167_v38 = vpop.f32.mrb[60].mxu0  ;;  %v3177_v47 = vadd.f32 %v1153_v34, %v961_v50 }
 0x16b   : > { %v2427_v15 = vpop.eup %2426  ;;  %2446 = vrcp.f32 %v1560_v22  ;;  %v3171_v32 = vpop.f32.mrb[61].mxu0  ;;  %v2142_v29 = vmul.f32 -1.442695, %v3165_v24 }
 0x16c   : > { %v2429_v39 = vpop.eup %2428  ;;  %2448 = vtanh.f32 %v3121_v46  ;;  %v1797_v33 = vpack.c.bf16 %v1748_v55, %v1746_v35  ;;  %v3174_v43 = vpop.f32.mrb[62].mxu0  ;;  %v1561_v49 = vadd.f32 1.0, %v2427_v15 }
 0x16d   : > { %v2431_v44 = vpop.eup %2430  ;;  %2450 = vpow2.f32 %v2140_v48  ;;  %v3179_v25 = vpop.f32.mrb[63].mxu0 }
 0x16e   : > { %v2433_v17 = vpop.eup %2432  ;;  %2452 = vtanh.f32 %v3127_v27  ;;  %1845 = vmatprep.subr.bf16.mxu1 %v1797_v33  ;;  %v1158_v57 = vpop.permute.xlu0 %1157 }
 0x16f   : > { %v2435_v46 = vpop.eup %2434  ;;  %2454 = vtanh.f32 %v3137_v41  ;;  %1846 = vmatpush1.bf16.msra.mxu1 %v1796_v23  ;;  %v614_v14 = vpop.permute.xlu1 %613  ;;  %v1562_v5 = vadd.f32 1.0, %v2433_v17  ;;  %v3185_v27 = vadd.f32 %v1158_v57, %v965_v2  ;;  %v2143_v41 = vmul.f32 -1.442695, %v3177_v47 }
 0x170   : > { %v2437_v58 = vpop.eup %2436  ;;  %2456 = vpow2.f32 %v2141_v40  ;;  %v969_v1 = vadd.f32 %v3084_v26, %v614_v14  ;;  %v3189_v13 = vadd.f32 %v1158_v57, %v967_v0  ;;  %v971_v48 = vadd.f32 %v3087_v30, %v614_v14 }
 0x171   : > { %v2439_v3 = vpop.eup %2438  ;;  %2458 = vtanh.f32 %v3143_v54  ;;  %v1749_v16 = vmul.f32 %v2437_v58, %v2425_v21  ;;  %v2144_v53 = vmul.f32 -1.442695, %v3185_v27 }
 0x172   : > { %v2441_v45 = vpop.eup %2440  ;;  %2460 = vrcp.f32 %v1561_v49  ;;  %v1563_v37 = vadd.f32 1.0, %v2439_v3  ;;  %v619_v4 = vpop.permute.xlu0 %618  ;;  %v2145_v50 = vmul.f32 -1.442695, %v3189_v13 }
 0x173   : > { %v2443_v9 = vpop.eup %2442  ;;  %2462 = vpow2.f32 %v2142_v29  ;;  %v1751_v31 = vmul.f32 %v2441_v45, %v2431_v44  ;;  %v1163_v22 = vpop.permute.xlu1 %1162  ;;  %v975_v15 = vadd.f32 %v3103_v52, %v619_v4  ;;  %v977_v49 = vadd.f32 %v3107_v61, %v619_v4 }
 0x174   : > { %v2445_v60 = vpop.eup %2444  ;;  %2464 = vrcp.f32 %v1563_v37  ;;  %v1750_v23 = vmul.f32 %v2443_v9, %v2429_v39  ;;  %v3193_v56 = vadd.f32 %v1163_v22, %v969_v1  ;;  %v3199_v30 = vadd.f32 %v1163_v22, %v971_v48 }
 0x175   : > { %v2447_v42 = vpop.eup %2446  ;;  %2466 = vrcp.f32 %v1562_v5  ;;  %v1564_v54 = vadd.f32 1.0, %v2445_v60  ;;  %v1798_v19 = vpack.c.bf16 %v1751_v31, %v1749_v16 }
 0x176   : > { %v2449_v20 = vpop.eup %2448  ;;  %2468 = vpow2.f32 %v2143_v41  ;;  %v1752_v26 = vmul.f32 %v2447_v42, %v2435_v46  ;;  %v2146_v44 = vmul.f32 -1.442695, %v3193_v56  ;;  %v1168_v2 = vpop.permute.xlu0 %1167 }
 0x177   : > { %v2451_v21 = vpop.eup %2450  ;;  %2470 = vrcp.f32 %v1564_v54  ;;  %v624_v17 = vpop.permute.xlu1 %623  ;;  %v3209_v61 = vadd.f32 %v1168_v2, %v977_v49 }
 0x178   : > { %v2453_v34 = vpop.eup %2452  ;;  %2472 = vtanh.f32 %v3153_v63  ;;  %v1799_v35 = vpack.c.bf16 %v1752_v26, %v1750_v23  ;;  %v1565_v33 = vadd.f32 1.0, %v2451_v21  ;;  %v979_v14 = vadd.f32 %v3110_v62, %v624_v17 }
 0x179   : > { %v2455_v55 = vpop.eup %2454  ;;  %2474 = vpow2.f32 %v2144_v53  ;;  %v981_v31 = vadd.f32 %v3115_v8, %v624_v17 }
 0x17a   : > { %v2457_v40 = vpop.eup %2456  ;;  %2476 = vtanh.f32 %v3161_v7  ;;  %1847 = vmatprep.subr.bf16.mxu1 %v1799_v35  ;;  %v3205_v7 = vadd.f32 %v1168_v2, %v975_v15  ;;  %v629_v1 = vpop.permute.xlu0 %628 }
 0x17b   : > { %v2459_v39 = vpop.eup %2458  ;;  %2478 = vtanh.f32 %v3165_v24  ;;  %1848 = vmatpush1.bf16.msra.mxu1 %v1798_v19  ;;  %v1566_v46 = vadd.f32 1.0, %v2457_v40  ;;  %v2147_v24 = vmul.f32 -1.442695, %v3199_v30  ;;  %v1173_v16 = vpop.permute.xlu1 %1172  ;;  %v2149_v19 = vmul.f32 -1.442695, %v3209_v61 }
 0x17c   : > { %v2461_v63 = vpop.eup %2460  ;;  %2480 = vpow2.f32 %v2145_v50  ;;  %v2148_v37 = vmul.f32 -1.442695, %v3205_v7  ;;  %v3213_v54 = vadd.f32 %v1173_v16, %v979_v14  ;;  %v985_v22 = vadd.f32 %v3125_v6, %v629_v1 }
 0x17d   : > { %v2463_v52 = vpop.eup %2462  ;;  %2482 = vtanh.f32 %v3177_v47  ;;  %v1753_v0 = vmul.f32 %v2461_v63, %v2449_v20  ;;  %v3219_v8 = vadd.f32 %v1173_v16, %v981_v31  ;;  %v987_v35 = vadd.f32 %v3129_v11, %v629_v1 }
 0x17e   : > { %v2465_v29 = vpop.eup %2464  ;;  %2484 = vrcp.f32 %v1565_v33  ;;  %v1567_v58 = vadd.f32 1.0, %v2463_v52  ;;  %v2150_v21 = vmul.f32 -1.442695, %v3213_v54 }
 0x17f   : > { %v2467_v57 = vpop.eup %2466  ;;  %2486 = vpow2.f32 %v2146_v44  ;;  %v1755_v3 = vmul.f32 %v2465_v29, %v2455_v55  ;;  %v634_v50 = vpop.permute.xlu1 %633 }
 0x180   : > { %v2469_v5 = vpop.eup %2468  ;;  %2488 = vrcp.f32 %v1567_v58  ;;  %v1754_v60 = vmul.f32 %v2467_v57, %v2453_v34  ;;  %v1178_v34 = vpop.permute.xlu0 %1177 }
 0x181   : > { %v2471_v45 = vpop.eup %2470  ;;  %2490 = vrcp.f32 %v1566_v46  ;;  %v1568_v47 = vadd.f32 1.0, %v2469_v5  ;;  %v1800_v41 = vpack.c.bf16 %v1755_v3, %v1753_v0  ;;  %v3229_v11 = vadd.f32 %v1178_v34, %v987_v35 }
 0x182   : > { %v2473_v9 = vpop.eup %2472  ;;  %2492 = vpow2.f32 %v2147_v24  ;;  %v1756_v62 = vmul.f32 %v2471_v45, %v2459_v39  ;;  %v989_v39 = vadd.f32 %v3132_v36, %v634_v50  ;;  %v991_v24 = vadd.f32 %v3135_v51, %v634_v50 }
 0x183   : > { %v2475_v42 = vpop.eup %2474  ;;  %2494 = vrcp.f32 %v1568_v47  ;;  %v1183_v58 = vpop.permute.xlu1 %1182  ;;  %v2153_v5 = vmul.f32 -1.442695, %v3229_v11 }
 0x184   : > { %v2477_v53 = vpop.eup %2476  ;;  %2496 = vtanh.f32 %v3185_v27  ;;  %v1801_v20 = vpack.c.bf16 %v1756_v62, %v1754_v60  ;;  %v1569_v23 = vadd.f32 1.0, %v2475_v42  ;;  %v639_v29 = vpop.permute.xlu0 %638  ;;  %v3233_v0 = vadd.f32 %v1183_v58, %v989_v39 }
 0x185   : > { %v2479_v4 = vpop.eup %2478  ;;  %2498 = vpow2.f32 %v2148_v37  ;;  %v995_v37 = vadd.f32 %v3147_v59, %v639_v29  ;;  %v3239_v51 = vadd.f32 %v1183_v58, %v991_v24  ;;  %v997_v62 = vadd.f32 %v3150_v18, %v639_v29 }
 0x186   : > { %v2481_v48 = vpop.eup %2480  ;;  %2500 = vtanh.f32 %v3189_v13  ;;  %1849 = vmatprep.subr.bf16.mxu1 %v1801_v20  ;;  %v3225_v13 = vadd.f32 %v1178_v34, %v985_v22  ;;  %v2154_v16 = vmul.f32 -1.442695, %v3233_v0 }
 0x187   : > { %v2483_v26 = vpop.eup %2482  ;;  %2502 = vtanh.f32 %v3193_v56  ;;  %1850 = vmatpush1.bf16.msra.mxu1 %v1800_v41  ;;  %v1570_v55 = vadd.f32 1.0, %v2481_v48  ;;  %v2151_v56 = vmul.f32 -1.442695, %v3219_v8  ;;  %v644_v60 = vpop.permute.xlu1 %643 }
 0x188   : > { %v2485_v27 = vpop.eup %2484  ;;  %2504 = vpow2.f32 %v2149_v19  ;;  %v2152_v49 = vmul.f32 -1.442695, %v3225_v13  ;;  %v1188_v31 = vpop.permute.xlu0 %1187 }
 0x189   : > { %v2487_v6 = vpop.eup %2486  ;;  %2506 = vtanh.f32 %v3199_v30  ;;  %v1757_v44 = vmul.f32 %v2485_v27, %v2473_v9  ;;  %v3249_v18 = vadd.f32 %v1188_v31, %v997_v62 }
 0x18a   : > { %v2489_v15 = vpop.eup %2488  ;;  %2508 = vrcp.f32 %v1569_v23  ;;  %v1571_v40 = vadd.f32 1.0, %v2487_v6  ;;  %v1001_v6 = vadd.f32 %v3158_v12, %v644_v60 }
 0x18b   : > { %v2491_v33 = vpop.eup %2490  ;;  %2510 = vpow2.f32 %v2150_v21  ;;  %v1759_v63 = vmul.f32 %v2489_v15, %v2479_v4  ;;  %v999_v4 = vadd.f32 %v3155_v10, %v644_v60  ;;  %v1193_v35 = vpop.permute.xlu1 %1192 }
 0x18c   : > { %v2493_v2 = vpop.eup %2492  ;;  %2512 = vrcp.f32 %v1571_v40  ;;  %v1758_v57 = vmul.f32 %v2491_v33, %v2477_v53  ;;  %v649_v50 = vpop.permute.xlu0 %648  ;;  %v2157_v33 = vmul.f32 -1.442695, %v3249_v18  ;;  %v1264_v12 = vadd.f32 %v1193_v35, %v1001_v6 }
 0x18d   : > { %v2495_v17 = vpop.eup %2494  ;;  %2514 = vrcp.f32 %v1570_v55  ;;  %v1572_v30 = vadd.f32 1.0, %v2493_v2  ;;  %v1802_v52 = vpack.c.bf16 %v1759_v63, %v1757_v44  ;;  %v3253_v40 = vadd.f32 %v1193_v35, %v999_v4 }
 0x18e   : > { %v2497_v46 = vpop.eup %2496  ;;  %2516 = vpow2.f32 %v2151_v56  ;;  %v1760_v36 = vmul.f32 %v2495_v17, %v2483_v26  ;;  %v1005_v63 = vadd.f32 %v3167_v38, %v649_v50  ;;  %v1007_v29 = vadd.f32 %v3171_v32, %v649_v50 }
 0x18f   : > { %v2499_v14 = vpop.eup %2498  ;;  %2518 = vrcp.f32 %v1572_v30 }
 0x190   : > { %v2501_v3 = vpop.eup %2500  ;;  %2520 = vtanh.f32 %v3205_v7  ;;  %v1803_v45 = vpack.c.bf16 %v1760_v36, %v1758_v57  ;;  %v1573_v9 = vadd.f32 1.0, %v2499_v14  ;;  %v2159_v36 = vmul.f32 -1.442695, %v1264_v12 }
 0x191   : > { %v2503_v47 = vpop.eup %2502  ;;  %2522 = vpow2.f32 %v2152_v49  ;;  %v2158_v49 = vmul.f32 -1.442695, %v3253_v40 }
 0x192   : > { %v2505_v41 = vpop.eup %2504  ;;  %2524 = vtanh.f32 %v3209_v61  ;;  %1851 = vmatprep.subr.bf16.mxu1 %v1803_v45  ;;  %v3245_v61 = vadd.f32 %v1188_v31, %v995_v37 }
 0x193   : > { %v2507_v1 = vpop.eup %2506  ;;  %2526 = vtanh.f32 %v3213_v54  ;;  %1852 = vmatpush1.bf16.msra.mxu1 %v1802_v52  ;;  %v1574_v42 = vadd.f32 1.0, %v2505_v41  ;;  %v2155_v54 = vmul.f32 -1.442695, %v3239_v51  ;;  %v1198_v52 = vpop.permute.xlu0 %1197 }
 0x194   : > { %v2509_v7 = vpop.eup %2508  ;;  %2528 = vpow2.f32 %v2153_v5  ;;  %v2156_v21 = vmul.f32 -1.442695, %v3245_v61  ;;  %v3263_v24 = vadd.f32 %v1198_v52, %v1005_v63 }
 0x195   : > { %v2511_v59 = vpop.eup %2510  ;;  %2530 = vtanh.f32 %v3219_v8  ;;  %v1761_v22 = vmul.f32 %v2509_v7, %v2497_v46  ;;  %v654_v46 = vpop.permute.xlu1 %653 }
 0x196   : > { %v2513_v53 = vpop.eup %2512  ;;  %2532 = vrcp.f32 %v1573_v9  ;;  %v1575_v19 = vadd.f32 1.0, %v2511_v59  ;;  %v2160_v41 = vmul.f32 -1.442695, %v3263_v24 }
 0x197   : > { %v2515_v20 = vpop.eup %2514  ;;  %2534 = vpow2.f32 %v2154_v16  ;;  %v1763_v48 = vmul.f32 %v2513_v53, %v2503_v47  ;;  %v3266_v47 = vadd.f32 %v1198_v52, %v1007_v29  ;;  %v1011_v16 = vadd.f32 %v3179_v25, %v654_v46 }
 0x198   : > { %v2517_v23 = vpop.eup %2516  ;;  %2536 = vrcp.f32 %v1575_v19  ;;  %v1762_v55 = vmul.f32 %v2515_v20, %v2501_v3 }
 0x199   : > { %v2519_v26 = vpop.eup %2518  ;;  %2538 = vrcp.f32 %v1574_v42  ;;  %v1576_v8 = vadd.f32 1.0, %v2517_v23  ;;  %v1804_v27 = vpack.c.bf16 %v1763_v48, %v1761_v22  ;;  %v2161_v59 = vmul.f32 -1.442695, %v3266_v47 }
 0x19a   : > { %v2521_v34 = vpop.eup %2520  ;;  %2540 = vpow2.f32 %v2155_v54  ;;  %v1764_v10 = vmul.f32 %v2519_v26, %v2507_v1  ;;  %v1203_v1 = vpop.permute.xlu1 %1202 }
 0x19b   : > { %v2523_v15 = vpop.eup %2522  ;;  %2542 = vrcp.f32 %v1576_v8  ;;  %v1268_v20 = vadd.f32 %v1203_v1, %v1011_v16 }
 0x19c   : > { %v2525_v56 = vpop.eup %2524  ;;  %2544 = vtanh.f32 %v3225_v13  ;;  %v1805_v39 = vpack.c.bf16 %v1764_v10, %v1762_v55  ;;  %v1577_v17 = vadd.f32 1.0, %v2523_v15 }
 0x19d   : > { %v2527_v44 = vpop.eup %2526  ;;  %2546 = vpow2.f32 %v2156_v21  ;;  %v2163_v8 = vmul.f32 -1.442695, %v1268_v20 }
 0x19e   : > { %v2529_v2 = vpop.eup %2528  ;;  %2548 = vtanh.f32 %v3229_v11  ;;  %1853 = vmatprep.subr.bf16.mxu1 %v1805_v39 }
 0x19f   : > { %v2531_v30 = vpop.eup %2530  ;;  %2550 = vtanh.f32 %v3233_v0  ;;  %1854 = vmatpush1.bf16.msra.mxu1 %v1804_v27  ;;  %v1578_v38 = vadd.f32 1.0, %v2529_v2  ;;  %v1009_v0 = vadd.f32 %v3174_v43, %v654_v46 }
 0x1a0   : > { %v2533_v13 = vpop.eup %2532  ;;  %2552 = vpow2.f32 %v2157_v33 }
 0x1a1   : > { %v2535_v58 = vpop.eup %2534  ;;  %2554 = vtanh.f32 %v3239_v51  ;;  %v1765_v3 = vmul.f32 %v2533_v13, %v2521_v34  ;;  %v1267_v60 = vadd.f32 %v1203_v1, %v1009_v0 }
 0x1a2   : > { %v2537_v11 = vpop.eup %2536  ;;  %2556 = vrcp.f32 %v1577_v17  ;;  %v1579_v57 = vadd.f32 1.0, %v2535_v58 }
 0x1a3   : > { %v2539_v14 = vpop.eup %2538  ;;  %2558 = vpow2.f32 %v2158_v49  ;;  %v1767_v5 = vmul.f32 %v2537_v11, %v2527_v44  ;;  %v2162_v4 = vmul.f32 -1.442695, %v1267_v60 }
 0x1a4   : > { %v2541_v45 = vpop.eup %2540  ;;  %2560 = vrcp.f32 %v1579_v57  ;;  %v1766_v7 = vmul.f32 %v2539_v14, %v2525_v56 }
 0x1a5   : > { %v2543_v32 = vpop.eup %2542  ;;  %2562 = vrcp.f32 %v1578_v38  ;;  %v1580_v37 = vadd.f32 1.0, %v2541_v45  ;;  %v1806_v9 = vpack.c.bf16 %v1767_v5, %v1765_v3 }
 0x1a6   : > { %v2545_v51 = vpop.eup %2544  ;;  %2564 = vpow2.f32 %v2159_v36  ;;  %v1768_v31 = vmul.f32 %v2543_v32, %v2531_v30 }
 0x1a7   : > { %v2547_v43 = vpop.eup %2546  ;;  %2566 = vrcp.f32 %v1580_v37 }
 0x1a8   : > { %v2549_v62 = vpop.eup %2548  ;;  %2568 = vtanh.f32 %v3245_v61  ;;  %v1807_v42 = vpack.c.bf16 %v1768_v31, %v1766_v7  ;;  %v1581_v54 = vadd.f32 1.0, %v2547_v43  ;;  %v1818_v43 = vpop.permute.xlu0 %1817 }
 0x1a9   : > { %v2551_v53 = vpop.eup %2550  ;;  %2570 = vpow2.f32 %v2160_v41 }
 0x1aa   : > { %v2553_v19 = vpop.eup %2552  ;;  %2572 = vtanh.f32 %v3249_v18  ;;  %1855 = vmatprep.subr.bf16.mxu1 %v1807_v42 }
 0x1ab   : > { %v2555_v25 = vpop.eup %2554  ;;  %2574 = vtanh.f32 %v3253_v40  ;;  %1856 = vmatpush1.bf16.msra.mxu1 %v1806_v9  ;;  %v1582_v61 = vadd.f32 1.0, %v2553_v19  ;;  %v1877_v19 = vld [vmem:[%s398_s16] sm:$0xff] }
 0x1ac   : > { %v2557_v22 = vpop.eup %2556  ;;  %2576 = vpow2.f32 %v2161_v59 }
 0x1ad   : > { %v2559_v48 = vpop.eup %2558  ;;  %2578 = vtanh.f32 %v1264_v12  ;;  %v1769_v27 = vmul.f32 %v2557_v22, %v2545_v51 }
 0x1ae   : > { %v2561_v23 = vpop.eup %2560  ;;  %2580 = vrcp.f32 %v1581_v54  ;;  %v1583_v26 = vadd.f32 1.0, %v2559_v48 }
 0x1af   : > { %v2563_v21 = vpop.eup %2562  ;;  %2582 = vpow2.f32 %v2162_v4  ;;  %v1771_v18 = vmul.f32 %v2561_v23, %v2551_v53 }
 0x1b0   : > { %v2565_v34 = vpop.eup %2564  ;;  %2584 = vrcp.f32 %v1583_v26  ;;  %v1770_v10 = vmul.f32 %v2563_v21, %v2549_v62 }
 0x1b1   : > { %v2567_v50 = vpop.eup %2566  ;;  %2586 = vrcp.f32 %v1582_v61  ;;  %v1584_v35 = vadd.f32 1.0, %v2565_v34  ;;  %v1808_v6 = vpack.c.bf16 %v1771_v18, %v1769_v27 }
 0x1b2   : > { %v2569_v55 = vpop.eup %2568  ;;  %2588 = vpow2.f32 %v2163_v8  ;;  %v1772_v15 = vmul.f32 %v2567_v50, %v2555_v25 }
 0x1b3   : > { %v2571_v40 = vpop.eup %2570  ;;  %2590 = vrcp.f32 %v1584_v35 }
 0x1b4   : > { %v2573_v56 = vpop.eup %2572  ;;  %v1809_v33 = vpack.c.bf16 %v1772_v15, %v1770_v10  ;;  %v1585_v63 = vadd.f32 1.0, %v2571_v40  ;;  %2592 = vtanh.f32 %v3263_v24 }
 0x1b5   : > { %v2575_v39 = vpop.eup %2574  ;;  %2594 = vtanh.f32 %v3266_v47 }
 0x1b6   : > { %v2577_v44 = vpop.eup %2576  ;;  %1857 = vmatprep.subr.bf16.mxu1 %v1809_v33  ;;  %2596 = vrcp.f32 %v1585_v63 }
 0x1b7   : > { %v2579_v2 = vpop.eup %2578  ;;  %1858 = vmatpush1.bf16.msra.mxu1 %v1808_v6  ;;  %v1586_v30 = vadd.f32 1.0, %v2577_v44  ;;  %2598 = vtanh.f32 %v1267_v60 }
 0x1b8   : > { %v2581_v17 = vpop.eup %2580 }
 0x1b9   : > { %v2583_v12 = vpop.eup %2582  ;;  %v1773_v46 = vmul.f32 %v2581_v17, %v2569_v55 }
 0x1ba   : > { %v2585_v49 = vpop.eup %2584  ;;  %v1587_v13 = vadd.f32 1.0, %v2583_v12 }
 0x1bb   : > { %v2587_v52 = vpop.eup %2586  ;;  %v1775_v29 = vmul.f32 %v2585_v49, %v2575_v39 }
 0x1bc   : > { %v2589_v58 = vpop.eup %2588  ;;  %2600 = vrcp.f32 %v1587_v13  ;;  %v1774_v36 = vmul.f32 %v2587_v52, %v2573_v56 }
 0x1bd   : > { %v2591_v38 = vpop.eup %2590  ;;  %2602 = vrcp.f32 %v1586_v30  ;;  %v1588_v11 = vadd.f32 1.0, %v2589_v58  ;;  %v1810_v57 = vpack.c.bf16 %v1775_v29, %v1773_v46 }
 0x1be   : > { %2604 = vtanh.f32 %v1268_v20  ;;  %v1776_v24 = vmul.f32 %v2591_v38, %v2579_v2  ;;  %v2593_v0 = vpop.eup %2592 }
 0x1bf   : > { %2606 = vrcp.f32 %v1588_v11  ;;  %v2595_v3 = vpop.eup %2594 }
 0x1c0   : > { %v1811_v14 = vpack.c.bf16 %v1776_v24, %v1774_v36  ;;  %v2597_v5 = vpop.eup %2596 }
 0x1c1   : > { %v2599_v45 = vpop.eup %2598  ;;  %v1777_v37 = vmul.f32 %v2597_v5, %v2593_v0 }
 0x1c2   : > { %1859 = vmatprep.subr.bf16.mxu1 %v1811_v14 }
 0x1c3   : > { %1860 = vmatpush1.bf16.msra.mxu1 %v1810_v57 }
 0x1c6   : > { %v2601_v47 = vpop.eup %2600 }
 0x1c7   : > { %v2603_v32 = vpop.eup %2602  ;;  %v1779_v41 = vmul.f32 %v2601_v47, %v2599_v45 }
 0x1c8   : > { %v2605_v9 = vpop.eup %2604  ;;  %v1778_v16 = vmul.f32 %v2603_v32, %v2595_v3 }
 0x1c9   : > { %v2607_v51 = vpop.eup %2606  ;;  %v1812_v1 = vpack.c.bf16 %v1779_v41, %v1777_v37 }
 0x1ca   : > { %v1780_v7 = vmul.f32 %v2607_v51, %v2605_v9 }
 0x1cc   : > { %v1813_v31 = vpack.c.bf16 %v1780_v7, %v1778_v16 }
 0x1ce   : > { %1861 = vmatprep.subr.bf16.mxu1 %v1813_v31 }
 0x1cf   : > { %1862 = vmatpush1.bf16.msra.mxu1 %v1812_v1 }
 0x1d2   : > { %1864 = vmatmul.mubr.bf16.vlgmr.msra.gmra.mrb[0].mxu1 %v3093_v28 }
 0x2a5   : > { %v1865_v60 = vpop.f32.mrb[0].mxu1 }
 0x2a6   : > { %v1866_v62 = vadd.f32 %v1865_v60, %v1818_v43  ;;  %v1867_v59 = vpop.f32.mrb[1].mxu1 }
 0x2a7   : > { %v1868_v42 = vadd.f32 %v1867_v59, %v1818_v43  ;;  %v1869_v53 = vpop.f32.mrb[2].mxu1 }
 0x2a8   : > { %v1870_v54 = vpop.f32.mrb[3].mxu1 }
 0x2a9   : > { %v1874_v20 = vcombine.low %v1866_v62, %v1868_v42 }
 0x2ab   : > { %1876 = vst [vmem:[%s423_s20] sm:$0xff] %v1874_v20  ;;  %v1878_v28 = vadd.f32 %v1877_v19, %v1874_v20 }
 0x2ad   : > { %1879 = vst [vmem:[%s413_s27] sm:$0xff] %v1878_v28 }
 0x2ae PF: > { %s19_s29 = sadd.s32 1, %s2630_s29   ;;  %s3305_s27 = smov %s2626_s28 }
 0x2af   : > { %p16_p5 = scmp.ge.s32.totalorder %s19_s29, 4   ;;  %s3306_s28 = smov %s3308_s30 }
 0x2b1   :  { %18 = sbr.rel (!%p16_p5) target bundleno = 2 (0x2), region = 96 }

</bundles_post_ra>
